<compile_context>
chip_gen: v7x
topology: tpu7x:2x2x1
jax: 0.10.0
libtpu: 0.0.40
codegen_flags: <defaults>
</compile_context>

<pallas_src>
import functools

import jax
import jax.numpy as jnp
from jax.experimental import pallas as pl
from jax.experimental.pallas import tpu as pltpu

GEM_P = 3.0
GEM_EPS = 1e-6
_NEG_INF = -1e9


def _round_up(n, m):
    return ((n + m - 1) // m) * m


def _net_head_kernel(x_ref, w_ref, bias_ref, fcw_ref, fcb_ref, tgt_ref,
                     out_ref, acc_ref, *, hw_valid, n_classes, mask_hw):
    h = pl.program_id(1)

    @pl.when(h == 0)
    def _():
        acc_ref[...] = jnp.zeros_like(acc_ref)

    # 1x1 conv (BN scale pre-folded into w) as ONE MXU matmul on the raw NCHW
    # slab:  (Cout_p, Cin) @ (Cin, THW) -> (Cout_p, THW).  No transposes.
    x2d = x_ref[0]                                            # (Cin, THW) f32
    y = jnp.dot(w_ref[...], x2d, preferred_element_type=jnp.float32)
    y = y + bias_ref[...]                                     # fused BN bias (Cout_p, 1)
    # SiLU (act2): y * sigmoid(y); exp + approx reciprocal both ride the EUP.
    y = y * pl.reciprocal(1.0 + jnp.exp(-y), approx=True)

    # GeM partial sum over this HW tile: clamp(y, eps)^3, lane (XLU) reduce.
    yc = jnp.maximum(y, GEM_EPS)
    y3 = yc * yc * yc
    if mask_hw:
        thw = y3.shape[-1]
        col = jax.lax.broadcasted_iota(jnp.int32, (1, thw), 1)
        y3 = jnp.where(h * thw + col < hw_valid, y3, 0.0)     # mask padded columns
    acc_ref[...] += jnp.sum(y3, axis=-1, keepdims=True)       # (Cout_p, 1)

    @pl.when(h == pl.num_programs(1) - 1)
    def _():
        pooled = acc_ref[...] * (1.0 / hw_valid)              # spatial mean
        pooled = jnp.exp(jnp.log(pooled) * (1.0 / GEM_P))     # ^(1/p); >= eps^p so log is finite
        logits = jnp.dot(fcw_ref[...], pooled,
                         preferred_element_type=jnp.float32) + fcb_ref[...]   # (NC_p, 1)
        # DenseCrossEntropy per sample; batch mean happens in the wrapper so
        # the b grid axis stays "parallel".
        m = jnp.max(logits, axis=0, keepdims=True)
        z = logits - m
        lse = jnp.log(jnp.sum(jnp.exp(z), axis=0, keepdims=True))
        loss = jnp.sum(-(z - lse) * tgt_ref[0], axis=0, keepdims=True)        # (1, 1)
        # Stash the per-sample CE in an unused padded logits row -> one output slab.
        row = jax.lax.broadcasted_iota(jnp.int32, logits.shape, 0)
        out_ref[0] = jnp.where(row == n_classes, loss, logits)


def net_class_head(feat_nchw, params, target):
    """Classification branch of Net.forward as one fused, gridded Pallas kernel.

    feat_nchw : (B, Cin, H, W) feature map (stands in for x_out[2]).
    params    : conv_head / bn2 / fc_head parameters.
    target    : (B, n_classes) dense class target.
    Returns (class_logits (B, n_classes) f32, class_loss2 scalar f32).
    """
    B, Cin, H, W = feat_nchw.shape
    Cout = params['conv_w'].shape[1]
    n_classes = params['fc_w'].shape[1]
    HW = H * W

    Cout_p = _round_up(Cout, 128)
    NC_p = _round_up(n_classes + 1, 128)     # +1 guarantees a spare row for the CE value

    # Feature map enters as raw NCHW (B, Cin, H*W) f32: reshape only, no copy pass.
    x = feat_nchw.reshape(B, Cin, HW)

    # Fold BN (inference form) scale into the conv weight; feed it transposed so
    # the conv is (Cout_p, Cin) @ (Cin, THW) with zero in-kernel transposes.
    bn_scale = params['bn_gamma'] / jnp.sqrt(params['bn_var'] + 1e-5)
    bn_bias = params['bn_beta'] - params['bn_mean'] * bn_scale
    w_t = jnp.pad((params['conv_w'] * bn_scale[None, :]).T,
                  ((0, Cout_p - Cout), (0, 0))).astype(jnp.float32)          # (Cout_p, Cin)
    bias = jnp.pad(bn_bias, (0, Cout_p - Cout)).reshape(Cout_p, 1).astype(jnp.float32)

    fcw_t = jnp.pad(params['fc_w'].T,
                    ((0, NC_p - n_classes), (0, Cout_p - Cout))).astype(jnp.float32)
    # Padded class rows get a very negative bias so softmax/CE ignore them.
    fcb = jnp.pad(params['fc_b'], (0, NC_p - n_classes),
                  constant_values=_NEG_INF).reshape(NC_p, 1).astype(jnp.float32)
    tgt = jnp.pad(target.astype(jnp.float32),
                  ((0, 0), (0, NC_p - n_classes))).reshape(B, NC_p, 1)

    # ---- VMEM-budget-based HW tile (v7x: 64 MiB phys; v5e/v6e: 128 MiB) ----
    try:
        phys_vmem = int(pltpu.get_tpu_info().vmem_capacity_bytes)
    except Exception:
        phys_vmem = 64 * 1024 * 1024
    vmem_limit = (phys_vmem * 3) // 4

    resident = 4 * 2 * (Cout_p * Cin + NC_p * Cout_p)          # double-buffered weights
    resident += 4 * 128 * (2 * Cout_p + 3 * NC_p)              # bias/fcb/tgt/out/acc slabs
    per_col = 4 * (2 * Cin + 3 * Cout_p)                       # x dbl-buffer + f32 y temps
    max_thw = max(128, (vmem_limit - resident - (4 << 20)) // per_col)

    if HW <= max_thw:
        THW, HWp, mask_hw = HW, HW, False
    else:
        THW = (max_thw // 128) * 128                           # lane-aligned tile
        HWp = _round_up(HW, THW)
        mask_hw = HWp != HW
        if mask_hw:
            # Padded spatial columns are masked in-kernel before the GeM accumulate.
            x = jnp.pad(x, ((0, 0), (0, 0), (0, HWp - HW)))

    # b axis "parallel" (>= 2 tiles whenever B >= 2 -> both v7x TCs busy),
    # HW reduction axis "arbitrary" and innermost.
    grid = (B, HWp // THW)

    cost = pl.CostEstimate(
        flops=2 * B * HW * Cin * Cout_p + 2 * B * Cout_p * NC_p,
        transcendentals=2 * B * HW * Cout_p + 2 * B * Cout_p + B * NC_p,
        bytes_accessed=(B * HWp * Cin * 4 + Cout_p * Cin * 4
                        + NC_p * Cout_p * 4 + 2 * B * NC_p * 4),
    )

    out = pl.pallas_call(
        functools.partial(_net_head_kernel, hw_valid=HW,
                          n_classes=n_classes, mask_hw=mask_hw),
        out_shape=jax.ShapeDtypeStruct((B, NC_p, 1), jnp.float32),
        grid_spec=pltpu.PrefetchScalarGridSpec(
            num_scalar_prefetch=0,
            grid=grid,
            in_specs=[
                pl.BlockSpec((1, Cin, THW), lambda b, h: (b, 0, h)),     # x, raw NCHW slab
                pl.BlockSpec((Cout_p, Cin), lambda b, h: (0, 0)),        # fused conv w^T
                pl.BlockSpec((Cout_p, 1), lambda b, h: (0, 0)),          # BN bias
                pl.BlockSpec((NC_p, Cout_p), lambda b, h: (0, 0)),       # fc w^T
                pl.BlockSpec((NC_p, 1), lambda b, h: (0, 0)),            # fc bias (-1e9 pad)
                pl.BlockSpec((1, NC_p, 1), lambda b, h: (b, 0, 0)),      # dense target
            ],
            out_specs=pl.BlockSpec((1, NC_p, 1), lambda b, h: (b, 0, 0)),
            scratch_shapes=[pltpu.VMEM((Cout_p, 1), jnp.float32)],       # GeM accumulator
        ),
        compiler_params=pltpu.CompilerParams(
            dimension_semantics=("parallel", "arbitrary"),
            vmem_limit_bytes=int(vmem_limit),
        ),
        cost_estimate=cost,
    )(x, w_t, bias, fcw_t, fcb, tgt)

    out2d = out[:, :, 0]                                       # (B, NC_p)
    logits = out2d[:, :n_classes]
    class_loss2 = jnp.mean(out2d[:, n_classes])                # DenseCrossEntropy batch mean
    return logits, class_loss2


def init_params(key, cin, cout, n_classes):
    """Deterministic synthetic parameters matching ConvHead + fc_head shapes."""
    k1, k2, k3, k4 = jax.random.split(key, 4)
    return {
        # conv_head: 1x1 conv, (Cin, Cout) after squeezing the 1x1 kernel dims.
        'conv_w': jax.random.normal(k1, (cin, cout), jnp.float32) * 0.05,
        # bn2 (inference statistics + affine params).
        'bn_gamma': jnp.ones((cout,), jnp.float32),
        'bn_beta': jnp.zeros((cout,), jnp.float32),
        'bn_mean': jax.random.normal(k2, (cout,), jnp.float32) * 0.1,
        'bn_var': jnp.abs(jax.random.normal(k3, (cout,), jnp.float32)) + 0.5,
        # fc_head: Linear(backbone_out -> n_classes).
        'fc_w': jax.random.normal(k4, (cout, n_classes), jnp.float32) * 0.05,
        'fc_b': jnp.zeros((n_classes,), jnp.float32),
    }


def _reference(feat, params, target):
    """Pure-JAX f32 reference of the same classification branch."""
    bn_scale = params['bn_gamma'] / jnp.sqrt(params['bn_var'] + 1e-5)
    bn_bias = params['bn_beta'] - params['bn_mean'] * bn_scale
    w = params['conv_w'] * bn_scale[None, :]
    x = jnp.transpose(feat, (0, 2, 3, 1))
    y = jnp.einsum('bhwc,cd->bhwd', x, w) + bn_bias
    y = y * jax.nn.sigmoid(y)
    pooled = jnp.mean(jnp.maximum(y, GEM_EPS) ** GEM_P, axis=(1, 2)) ** (1.0 / GEM_P)
    logits = pooled @ params['fc_w'] + params['fc_b']
    logprobs = jax.nn.log_softmax(logits, axis=-1)
    loss = jnp.mean(jnp.sum(-logprobs * target, axis=-1))
    return logits, loss


if __name__ == "__main__":
    # Small shapes consistent with the module's classification branch:
    #   batch=2, feature channels=16, spatial=8x8, conv_head out=32, 4 classes.
    B, Cin, H, W = 2, 16, 8, 8
    Cout, n_classes = 32, 4
    study_weight = 0.1

    key = jax.random.PRNGKey(0)
    kf, kt, kp = jax.random.split(key, 3)

    # Stands in for x_out[2] from the EfficientDet backbone.
    # TODO(synk): EfficientDet backbone / FPN / class_net / box_net /
    # AnchorLabeler / DetectionLoss are external detector components not
    # reproduced here; the detector loss term is therefore omitted.
    feat = jax.random.normal(kf, (B, Cin, H, W), jnp.float32)

    # One-hot style dense target (batch['target']).
    labels = jax.random.randint(kt, (B,), 0, n_classes)
    target = jax.nn.one_hot(labels, n_classes, dtype=jnp.float32)

    params = init_params(kp, Cin, Cout, n_classes)

    logits, class_loss2 = net_class_head(feat, params, target)
    # Total loss would be det_loss + study_weight * class_loss2; det_loss omitted.
    total_loss = study_weight * class_loss2
    jax.block_until_ready((logits, class_loss2, total_loss))

    ref_logits, ref_loss = _reference(feat, params, target)
    assert logits.shape == (B, n_classes)
    assert bool(jnp.isfinite(class_loss2))
    assert jnp.allclose(logits, ref_logits, rtol=2e-2, atol=2e-3)
    assert jnp.allclose(class_loss2, ref_loss, rtol=2e-2, atol=2e-3)
    print("KERNEL_OK")
</pallas_src>

<mosaic_0001>
module attributes {stable_mosaic.version = 11 : i64} {
  func.func @_net_head_kernel(%arg0: i32, %arg1: i32, %arg2: memref<1x16x64xf32, #tpu.memory_space<vmem>>, %arg3: memref<128x16xf32, #tpu.memory_space<vmem>>, %arg4: memref<128x1xf32, #tpu.memory_space<vmem>>, %arg5: memref<128x128xf32, #tpu.memory_space<vmem>>, %arg6: memref<128x1xf32, #tpu.memory_space<vmem>>, %arg7: memref<1x128x1xf32, #tpu.memory_space<vmem>>, %arg8: memref<1x128x1xf32, #tpu.memory_space<vmem>>, %arg9: memref<128x1xf32, #tpu.memory_space<vmem>>) attributes {dimension_semantics = [#tpu.dimension_semantics<parallel>, #tpu.dimension_semantics<arbitrary>], iteration_bounds = array<i64: 2, 1>, scalar_prefetch = 0 : i64, scratch_operands = 1 : i64, tpu.core_type = #tpu.core_type<tc>, window_params = [{transform_indices = @transform_0, window_bounds = array<i64: 1, 16, 64>}, {pipeline_mode = #tpu.pipeline_mode<synchronous>, transform_indices = @transform_1, window_bounds = array<i64: 128, 16>}, {pipeline_mode = #tpu.pipeline_mode<synchronous>, transform_indices = @transform_2, window_bounds = array<i64: 128, 1>}, {pipeline_mode = #tpu.pipeline_mode<synchronous>, transform_indices = @transform_3, window_bounds = array<i64: 128, 128>}, {pipeline_mode = #tpu.pipeline_mode<synchronous>, transform_indices = @transform_4, window_bounds = array<i64: 128, 1>}, {transform_indices = @transform_5, window_bounds = array<i64: 1, 128, 1>}, {transform_indices = @transform_6, window_bounds = array<i64: 1, 128, 1>}]} {
    %c0_i32 = arith.constant 0 : i32
    %0 = arith.cmpi eq, %arg1, %c0_i32 : i32
    %1 = arith.extui %0 : i1 to i32
    %c0_i32_0 = arith.constant 0 : i32
    %2 = arith.cmpi ne, %1, %c0_i32_0 : i32
    scf.if %2 {
      %cst_17 = arith.constant 0.000000e+00 : f32
      %29 = vector.broadcast %cst_17 : f32 to vector<128x1xf32>
      %c0_18 = arith.constant 0 : index
      %c0_19 = arith.constant 0 : index
      %30 = vector.load %arg9[%c0_18, %c0_19] : memref<128x1xf32, #tpu.memory_space<vmem>>, vector<128x1xf32>
      tpu.vector_store %arg9[%c0_18, %c0_19], %29 {strides = array<i32>} : memref<128x1xf32, #tpu.memory_space<vmem>>, vector<128x1xf32>,
    } else {
    }
    %c0 = arith.constant 0 : index
    %c0_1 = arith.constant 0 : index
    %c0_2 = arith.constant 0 : index
    %3 = vector.load %arg2[%c0, %c0_1, %c0_2] : memref<1x16x64xf32, #tpu.memory_space<vmem>>, vector<1x16x64xf32>
    %4 = vector.shape_cast %3 : vector<1x16x64xf32> to vector<16x64xf32>
    %c0_3 = arith.constant 0 : index
    %c0_4 = arith.constant 0 : index
    %5 = vector.load %arg3[%c0_3, %c0_4] : memref<128x16xf32, #tpu.memory_space<vmem>>, vector<128x16xf32>
    %cst = arith.constant dense<0.000000e+00> : vector<128x64xf32>
    %6 = tpu.matmul %5, %4, %cst {dimension_numbers = #tpu.dot_dimension_numbers<[1], [0], [0], [1], [0, 0, 1, 1], [], []>} : vector<128x16xf32>, vector<16x64xf32>, vector<128x64xf32> -> vector<128x64xf32>
    %c0_5 = arith.constant 0 : index
    %c0_6 = arith.constant 0 : index
    %7 = vector.load %arg4[%c0_5, %c0_6] : memref<128x1xf32, #tpu.memory_space<vmem>>, vector<128x1xf32>
    %8 = vector.broadcast %7 : vector<128x1xf32> to vector<128x64xf32>
    %9 = arith.addf %6, %8 : vector<128x64xf32>
    %cst_7 = arith.constant 0.000000e+00 : f32
    %10 = vector.broadcast %cst_7 : f32 to vector<128x64xf32>
    %11 = arith.subf %10, %9 : vector<128x64xf32>
    %12 = math.exp %11 : vector<128x64xf32>
    %cst_8 = arith.constant 1.000000e+00 : f32
    %13 = vector.broadcast %cst_8 : f32 to vector<128x64xf32>
    %14 = arith.addf %13, %12 : vector<128x64xf32>
    %15 = tpu.reciprocal %14 {approx = true} : vector<128x64xf32> -> vector<128x64xf32>
    %16 = arith.mulf %9, %15 : vector<128x64xf32>
    %cst_9 = arith.constant 9.99999997E-7 : f32
    %17 = vector.broadcast %cst_9 : f32 to vector<128x64xf32>
    %18 = arith.maximumf %16, %17 : vector<128x64xf32>
    %19 = arith.mulf %18, %18 : vector<128x64xf32>
    %20 = arith.mulf %19, %18 : vector<128x64xf32>
    %c0_10 = arith.constant 0 : index
    %c0_11 = arith.constant 0 : index
    %21 = vector.load %arg9[%c0_10, %c0_11] : memref<128x1xf32, #tpu.memory_space<vmem>>, vector<128x1xf32>
    %cst_12 = arith.constant dense<0.000000e+00> : vector<128xf32>
    %22 = vector.multi_reduction <add>, %20, %cst_12 [1] : vector<128x64xf32> to vector<128xf32>
    %23 = vector.shape_cast %22 : vector<128xf32> to vector<128x1xf32>
    %24 = arith.addf %21, %23 : vector<128x1xf32>
    %c0_13 = arith.constant 0 : index
    %c0_14 = arith.constant 0 : index
    %25 = vector.load %arg9[%c0_13, %c0_14] : memref<128x1xf32, #tpu.memory_space<vmem>>, vector<128x1xf32>
    tpu.vector_store %arg9[%c0_13, %c0_14], %24 {strides = array<i32>} : memref<128x1xf32, #tpu.memory_space<vmem>>, vector<128x1xf32>,
    %c0_i32_15 = arith.constant 0 : i32
    %26 = arith.cmpi eq, %arg1, %c0_i32_15 : i32
    %27 = arith.extui %26 : i1 to i32
    %c0_i32_16 = arith.constant 0 : i32
    %28 = arith.cmpi ne, %27, %c0_i32_16 : i32
    scf.if %28 {
      %c0_17 = arith.constant 0 : index
      %c0_18 = arith.constant 0 : index
      %29 = vector.load %arg9[%c0_17, %c0_18] : memref<128x1xf32, #tpu.memory_space<vmem>>, vector<128x1xf32>
      %cst_19 = arith.constant 1.562500e-02 : f32
      %30 = vector.broadcast %cst_19 : f32 to vector<128x1xf32>
      %31 = arith.mulf %29, %30 : vector<128x1xf32>
      %32 = math.log %31 : vector<128x1xf32>
      %cst_20 = arith.constant 0.333333343 : f32
      %33 = vector.broadcast %cst_20 : f32 to vector<128x1xf32>
      %34 = arith.mulf %32, %33 : vector<128x1xf32>
      %35 = math.exp %34 : vector<128x1xf32>
      %c0_21 = arith.constant 0 : index
      %c0_22 = arith.constant 0 : index
      %36 = vector.load %arg5[%c0_21, %c0_22] : memref<128x128xf32, #tpu.memory_space<vmem>>, vector<128x128xf32>
      %cst_23 = arith.constant dense<0.000000e+00> : vector<128x1xf32>
      %37 = tpu.matmul %36, %35, %cst_23 {dimension_numbers = #tpu.dot_dimension_numbers<[1], [0], [0], [1], [0, 0, 1, 1], [], []>} : vector<128x128xf32>, vector<128x1xf32>, vector<128x1xf32> -> vector<128x1xf32>
      %c0_24 = arith.constant 0 : index
      %c0_25 = arith.constant 0 : index
      %38 = vector.load %arg6[%c0_24, %c0_25] : memref<128x1xf32, #tpu.memory_space<vmem>>, vector<128x1xf32>
      %39 = arith.addf %37, %38 : vector<128x1xf32>
      %cst_26 = arith.constant dense<0xFF800000> : vector<1xf32>
      %40 = vector.multi_reduction <maximumf>, %39, %cst_26 [0] : vector<128x1xf32> to vector<1xf32>
      %41 = vector.shape_cast %40 : vector<1xf32> to vector<1x1xf32>
      %42 = vector.broadcast %41 : vector<1x1xf32> to vector<128x1xf32>
      %43 = arith.subf %39, %42 : vector<128x1xf32>
      %44 = math.exp %43 : vector<128x1xf32>
      %cst_27 = arith.constant dense<0.000000e+00> : vector<1xf32>
      %45 = vector.multi_reduction <add>, %44, %cst_27 [0] : vector<128x1xf32> to vector<1xf32>
      %46 = vector.shape_cast %45 : vector<1xf32> to vector<1x1xf32>
      %47 = math.log %46 : vector<1x1xf32>
      %48 = vector.broadcast %47 : vector<1x1xf32> to vector<128x1xf32>
      %49 = arith.subf %43, %48 : vector<128x1xf32>
      %cst_28 = arith.constant 0.000000e+00 : f32
      %50 = vector.broadcast %cst_28 : f32 to vector<128x1xf32>
      %51 = arith.subf %50, %49 : vector<128x1xf32>
      %c0_29 = arith.constant 0 : index
      %c0_30 = arith.constant 0 : index
      %c0_31 = arith.constant 0 : index
      %52 = vector.load %arg7[%c0_29, %c0_30, %c0_31] : memref<1x128x1xf32, #tpu.memory_space<vmem>>, vector<1x128x1xf32>
      %53 = vector.shape_cast %52 : vector<1x128x1xf32> to vector<128x1xf32>
      %54 = arith.mulf %51, %53 : vector<128x1xf32>
      %cst_32 = arith.constant dense<0.000000e+00> : vector<1xf32>
      %55 = vector.multi_reduction <add>, %54, %cst_32 [0] : vector<128x1xf32> to vector<1xf32>
      %56 = vector.shape_cast %55 : vector<1xf32> to vector<1x1xf32>
      %57 = tpu.iota {dimensions = array<i32: 0>} : vector<128x1xi32>
      %c4_i32 = arith.constant 4 : i32
      %58 = vector.broadcast %c4_i32 : i32 to vector<128x1xi32>
      %59 = arith.cmpi eq, %57, %58 : vector<128x1xi32>
      %60 = vector.shape_cast %56 : vector<1x1xf32> to vector<1x1xf32>
      %61 = vector.broadcast %60 : vector<1x1xf32> to vector<128x1xf32>
      %62 = arith.select %59, %61, %39 : vector<128x1xi1>, vector<128x1xf32>
      %c0_33 = arith.constant 0 : index
      %c0_34 = arith.constant 0 : index
      %c0_35 = arith.constant 0 : index
      %63 = vector.load %arg8[%c0_33, %c0_34, %c0_35] : memref<1x128x1xf32, #tpu.memory_space<vmem>>, vector<1x128x1xf32>
      %64 = vector.shape_cast %63 : vector<1x128x1xf32> to vector<128x1xf32>
      %65 = vector.shape_cast %62 : vector<128x1xf32> to vector<1x128x1xf32>
      tpu.vector_store %arg8[%c0_33, %c0_34, %c0_35], %65 {strides = array<i32>} : memref<1x128x1xf32, #tpu.memory_space<vmem>>, vector<1x128x1xf32>,
    } else {
    }
    return
  }
  func.func @transform_0(%arg0: i32, %arg1: i32) -> (i32, i32, i32) {
    %c0_i32 = arith.constant 0 : i32
    %c0_i32_0 = arith.constant 0 : i32
    return %arg0, %c0_i32, %arg1 : i32, i32, i32
  }
  func.func @transform_1(%arg0: i32, %arg1: i32) -> (i32, i32) {
    %c0_i32 = arith.constant 0 : i32
    %c0_i32_0 = arith.constant 0 : i32
    %c0_i32_1 = arith.constant 0 : i32
    return %c0_i32, %c0_i32_0 : i32, i32
  }
  func.func @transform_2(%arg0: i32, %arg1: i32) -> (i32, i32) {
    %c0_i32 = arith.constant 0 : i32
    %c0_i32_0 = arith.constant 0 : i32
    %c0_i32_1 = arith.constant 0 : i32
    return %c0_i32, %c0_i32_0 : i32, i32
  }
  func.func @transform_3(%arg0: i32, %arg1: i32) -> (i32, i32) {
    %c0_i32 = arith.constant 0 : i32
    %c0_i32_0 = arith.constant 0 : i32
    %c0_i32_1 = arith.constant 0 : i32
    return %c0_i32, %c0_i32_0 : i32, i32
  }
  func.func @transform_4(%arg0: i32, %arg1: i32) -> (i32, i32) {
    %c0_i32 = arith.constant 0 : i32
    %c0_i32_0 = arith.constant 0 : i32
    %c0_i32_1 = arith.constant 0 : i32
    return %c0_i32, %c0_i32_0 : i32, i32
  }
  func.func @transform_5(%arg0: i32, %arg1: i32) -> (i32, i32, i32) {
    %c0_i32 = arith.constant 0 : i32
    %c0_i32_0 = arith.constant 0 : i32
    %c0_i32_1 = arith.constant 0 : i32
    return %arg0, %c0_i32, %c0_i32_0 : i32, i32, i32
  }
  func.func @transform_6(%arg0: i32, %arg1: i32) -> (i32, i32, i32) {
    %c0_i32 = arith.constant 0 : i32
    %c0_i32_0 = arith.constant 0 : i32
    %c0_i32_1 = arith.constant 0 : i32
    return %arg0, %c0_i32, %c0_i32_0 : i32, i32, i32
  }
}

</mosaic_0001>

<bundles_post_ra>
// kernel: tpu_custom_call.1
= control target key start
LH: loop header
LB: loop body
LE: loop exit
PB: predicated region body
PF: predicated region fallthrough
CT: control target
= control target key end

     0   :  { %s1998_s21 = smov 0   ;;  %s2000_s22 = smov 0   ;;  %s2589_s0 = inlined_call_operand.vmem [shape: f32[2,16,64], index: 0, kind: input, shape index: {}]   ;;  %s2590_s1 = inlined_call_operand.vmem [shape: f32[128,16], index: 1, kind: input, shape index: {}]   ;;  %s2591_s2 = inlined_call_operand.vmem [shape: f32[128,1], index: 2, kind: input, shape index: {}]   ;;  %s2592_s3 = inlined_call_operand.vmem [shape: f32[128,128], index: 3, kind: input, shape index: {}]   ;;  %s2593_s4 = inlined_call_operand.vmem [shape: f32[128,1], index: 4, kind: input, shape index: {}]   ;;  %s2594_s5 = inlined_call_operand.vmem [shape: f32[2,128,1], index: 5, kind: input, shape index: {}]   ;;  %s2595_s6 = inlined_call_operand.vmem [shape: f32[2,128,1], index: 6, kind: output, shape index: {}]  }
   0x1   :  { %s2002_s23 = smov 0  }
   0x2 LB: > { %s28_s24 = sadd.s32 1, %s1955_s22  ;;  %p1533_p0 = scmp.ge.s32.totalorder %s1959_s23, 1  ;;  %s1959_s23 = sphi %s2002_s23, %s16_s23   ;;  %s1955_s22 = sphi %s2000_s22, %s2597_s22   ;;  %s1951_s21 = sphi %s1998_s21, %s2596_s21  }
   0x3   : > { %p30_p1 = scmp.ge.s32.totalorder %s28_s24, 2  ;;  %p239_p2 = scmp.lt.s32.totalorder %s1959_s23, 3 }
   0x5   : > { %s2599_s24 = smov (%p30_p1, %s28_s24), 0  ;;  %p240_p3 = pnand %p1533_p0, %p239_p2 }
   0x6   : > { %p277_p4 = scmp.lt.s32.totalorder (!%p240_p3), %s1951_s21, 1  ;;  %v318_v0 = vld [vmem:[%s2590_s1] sm:$0xff] (!%p240_p3)  ;;  %vm430_vm0 = vcmask (!%p240_p3), 130048   ;;  %v1961_v1 = vmov (!%p240_p3), 0   ;;  %v336_v2 = vld [vmem:[%s2591_s2 + $0x10] sm:$0xff] (!%p240_p3)  ;;  %v337_v7 = vld [vmem:[%s2591_s2 + $0x18] sm:$0xff] (!%p240_p3) }
   0x7   : > { %243 = sbr.rel (%p240_p3) target bundleno = 873 (0x369), region = 44  ;;  %1615 = vmatprep.mubr.msk.f32.mxu0 (!%p240_p3), %vm430_vm0, %v318_v0  ;;  %1774 = vset.pattern.permute.xlu1 (!%p240_p3), %v1961_v1  ;;  %v334_v3 = vld [vmem:[%s2591_s2] sm:$0xff] (!%p240_p3)  ;;  %v335_v8 = vld [vmem:[%s2591_s2 + $0x8] sm:$0xff] (!%p240_p3)  ;;  %v320_v10 = vld [vmem:[%s2590_s1 + $0x10] sm:$0xff] (!%p240_p3)  ;;  %vm299_vm1 = vcmask (!%p240_p3), 7168   ;;  %v1962_v36 = vmov (!%p240_p3), 0.0  }
   0x8   : > { %1773 = vset.pattern.permute.xlu0 (!%p240_p3), %v1961_v1  ;;  %362 = vperm.xlu1 (!%p240_p3), %1774, %v336_v2   ;;  %v319_v9 = vld [vmem:[%s2590_s1 + $0x8] sm:$0xff] (!%p240_p3)  ;;  %v338_v12 = vld [vmem:[%s2591_s2 + $0x20] sm:$0xff] (!%p240_p3)  ;;  %v321_v13 = vld [vmem:[%s2590_s1 + $0x18] sm:$0xff] (!%p240_p3)  ;;  %301 = vst.msk [vmem:[#allocation2 + $0x8] sm:$0xff] (!%p240_p3), %vm299_vm1, %v1962_v36  ;;  %vm784_vm2 = vcmask (!%p240_p3), 523264  }
   0x9   : > { %352 = vperm.xlu0 (!%p240_p3), %1773, %v334_v3   ;;  %v339_v11 = vld [vmem:[%s2591_s2 + $0x28] sm:$0xff] (!%p240_p3)  ;;  %v322_v14 = vld [vmem:[%s2590_s1 + $0x20] sm:$0xff] (!%p240_p3)  ;;  %v341_v15 = vld [vmem:[%s2591_s2 + $0x38] sm:$0xff] (!%p240_p3)  ;;  %300 = vst.msk [vmem:[#allocation2] sm:$0xff] (!%p240_p3), %vm299_vm1, %v1962_v36 }
   0xa   : > { %v340_v16 = vld [vmem:[%s2591_s2 + $0x30] sm:$0xff] (!%p240_p3)  ;;  %v323_v17 = vld [vmem:[%s2590_s1 + $0x28] sm:$0xff] (!%p240_p3)  ;;  %v342_v20 = vld [vmem:[%s2591_s2 + $0x40] sm:$0xff] (!%p240_p3)  ;;  %302 = vst.msk [vmem:[#allocation2 + $0x10] sm:$0xff] (!%p240_p3), %vm299_vm1, %v1962_v36 }
   0xb   : > { %v324_v18 = vld [vmem:[%s2590_s1 + $0x30] sm:$0xff] (!%p240_p3)  ;;  %v343_v19 = vld [vmem:[%s2591_s2 + $0x48] sm:$0xff] (!%p240_p3)  ;;  %v325_v21 = vld [vmem:[%s2590_s1 + $0x38] sm:$0xff] (!%p240_p3)  ;;  %303 = vst.msk [vmem:[#allocation2 + $0x18] sm:$0xff] (!%p240_p3), %vm299_vm1, %v1962_v36 }
   0xc   : > { %367 = vperm.xlu1 (!%p240_p3), %1774, %v337_v7   ;;  %v326_v22 = vld [vmem:[%s2590_s1 + $0x40] sm:$0xff] (!%p240_p3)  ;;  %v345_v23 = vld [vmem:[%s2591_s2 + $0x58] sm:$0xff] (!%p240_p3)  ;;  %v344_v24 = vld [vmem:[%s2591_s2 + $0x50] sm:$0xff] (!%p240_p3)  ;;  %304 = vst.msk [vmem:[#allocation2 + $0x20] sm:$0xff] (!%p240_p3), %vm299_vm1, %v1962_v36 }
   0xd   : > { %357 = vperm.xlu0 (!%p240_p3), %1773, %v335_v8   ;;  %v327_v25 = vld [vmem:[%s2590_s1 + $0x48] sm:$0xff] (!%p240_p3)  ;;  %v328_v26 = vld [vmem:[%s2590_s1 + $0x50] sm:$0xff] (!%p240_p3)  ;;  %v346_v28 = vld [vmem:[%s2591_s2 + $0x60] sm:$0xff] (!%p240_p3)  ;;  %305 = vst.msk [vmem:[#allocation2 + $0x28] sm:$0xff] (!%p240_p3), %vm299_vm1, %v1962_v36 }
   0xe   : > { %s2601_s21 = smov (!%p277_p4, %s1951_s21), 1  ;;  %v347_v27 = vld [vmem:[%s2591_s2 + $0x68] sm:$0xff]  ;;  %v329_v29 = vld [vmem:[%s2590_s1 + $0x58] sm:$0xff]  ;;  %v330_v30 = vld [vmem:[%s2590_s1 + $0x60] sm:$0xff]  ;;  %306 = vst.msk [vmem:[#allocation2 + $0x30] sm:$0xff] %vm299_vm1, %v1962_v36 }
   0xf   : > { %s1558_s27 = sshll.u32 %s2601_s21, 4  ;;  %v349_v31 = vld [vmem:[%s2591_s2 + $0x78] sm:$0xff]  ;;  %v348_v32 = vld [vmem:[%s2591_s2 + $0x70] sm:$0xff]  ;;  %v331_v33 = vld [vmem:[%s2590_s1 + $0x68] sm:$0xff]  ;;  %307 = vst.msk [vmem:[#allocation2 + $0x38] sm:$0xff] %vm299_vm1, %v1962_v36  ;;  %s1559_s25 = sshll.u32 %s2601_s21, 7 }
  0x10   : > { %s284_s30 = scalar_lea.vmem %s2589_s0, %s1558_s27  ;;  %377 = vperm.xlu1 %1774, %v339_v11   ;;  %v332_v34 = vld [vmem:[%s2590_s1 + $0x70] sm:$0xff]  ;;  %v333_v35 = vld [vmem:[%s2590_s1 + $0x78] sm:$0xff]  ;;  %308 = vst.msk [vmem:[#allocation2 + $0x40] sm:$0xff] %vm299_vm1, %v1962_v36  ;;  %309 = vst.msk [vmem:[#allocation2 + $0x48] sm:$0xff] %vm299_vm1, %v1962_v36  ;;  %s2309_s10 = scalar_lea.vmem %s2595_s6, %s1559_s25 }
  0x11   : > { %v316_v4 = vld [vmem:[%s284_s30] sm:$0xff]  ;;  %v317_v5 = vld [vmem:[%s284_s30 + $0x8] sm:$0xff]  ;;  %372 = vperm.xlu0 %1773, %v338_v12   ;;  %310 = vst.msk [vmem:[#allocation2 + $0x50] sm:$0xff] %vm299_vm1, %v1962_v36  ;;  %311 = vst.msk [vmem:[#allocation2 + $0x58] sm:$0xff] %vm299_vm1, %v1962_v36  ;;  %s2515_s26 = scalar_lea.vmem %s2594_s5, %s1559_s25 }
  0x12   : > { %v1695_v6 = vpack.c.bf16 %v317_v5, %v316_v4  ;;  %312 = vst.msk [vmem:[#allocation2 + $0x60] sm:$0xff] %vm299_vm1, %v1962_v36  ;;  %313 = vst.msk [vmem:[#allocation2 + $0x68] sm:$0xff] %vm299_vm1, %v1962_v36 }
  0x13   : > { %314 = vst.msk [vmem:[#allocation2 + $0x70] sm:$0xff] %vm299_vm1, %v1962_v36  ;;  %315 = vst.msk [vmem:[#allocation2 + $0x78] sm:$0xff] %vm299_vm1, %v1962_v36 }
  0x14   : > { %1696 = vmatprep.subr.bf16.mxu0 %v1695_v6  ;;  %387 = vperm.xlu1 %1774, %v341_v15  }
  0x15   : > { %1698 = vmatpush3.bf16.msra.mxu0 %v1695_v6  ;;  %382 = vperm.xlu0 %1773, %v340_v16  }
  0x18   : > { %1616 = vmatmul.mubr.msk.f32.vlgmr.msra.gmra.mrb[0].mxu0 %vm430_vm0, %v319_v9  ;;  %397 = vperm.xlu1 %1774, %v343_v19  }
  0x19   : > { %1618 = vmatprep.mubr.msk.f32.mxu0 %vm430_vm0, %v320_v10  ;;  %392 = vperm.xlu0 %1773, %v342_v20  }
  0x1c   : > { %1619 = vmatmul.mubr.msk.f32.gmra.mrb[2].mxu0 %vm430_vm0, %v321_v13  ;;  %407 = vperm.xlu1 %1774, %v345_v23  }
  0x1d   : > { %1621 = vmatprep.mubr.msk.f32.mxu0 %vm430_vm0, %v322_v14  ;;  %402 = vperm.xlu0 %1773, %v344_v24  }
  0x20   : > { %1622 = vmatmul.mubr.msk.f32.gmra.mrb[4].mxu0 %vm430_vm0, %v323_v17  ;;  %417 = vperm.xlu1 %1774, %v347_v27  }
  0x21   : > { %1624 = vmatprep.mubr.msk.f32.mxu0 %vm430_vm0, %v324_v18  ;;  %412 = vperm.xlu0 %1773, %v346_v28  }
  0x24   : > { %1625 = vmatmul.mubr.msk.f32.gmra.mrb[6].mxu0 %vm430_vm0, %v325_v21  ;;  %427 = vperm.xlu1 %1774, %v349_v31  }
  0x25   : > { %1627 = vmatprep.mubr.msk.f32.mxu0 %vm430_vm0, %v326_v22  ;;  %422 = vperm.xlu0 %1773, %v348_v32  }
  0x28   : > { %1628 = vmatmul.mubr.msk.f32.gmra.mrb[8].mxu0 %vm430_vm0, %v327_v25 }
  0x29   : > { %1630 = vmatprep.mubr.msk.f32.mxu0 %vm430_vm0, %v328_v26 }
  0x2c   : > { %1631 = vmatmul.mubr.msk.f32.gmra.mrb[10].mxu0 %vm430_vm0, %v329_v29 }
  0x2d   : > { %1633 = vmatprep.mubr.msk.f32.mxu0 %vm430_vm0, %v330_v30 }
  0x30   : > { %1634 = vmatmul.mubr.msk.f32.gmra.mrb[12].mxu0 %vm430_vm0, %v331_v33 }
  0x31   : > { %1636 = vmatprep.mubr.msk.f32.mxu0 %vm430_vm0, %v332_v34 }
  0x34   : > { %1637 = vmatmul.mubr.msk.f32.gmra.mrb[14].mxu0 %vm430_vm0, %v333_v35 }
  0x87   : > { %v363_v37 = vpop.permute.xlu1 %362 }
  0x88   : > { %v353_v38 = vpop.permute.xlu0 %352 }
  0x8b   : > { %v368_v39 = vpop.permute.xlu1 %367 }
  0x8c   : > { %v358_v40 = vpop.permute.xlu0 %357 }
  0x8f   : > { %v378_v41 = vpop.permute.xlu1 %377 }
  0x90   : > { %v373_v42 = vpop.permute.xlu0 %372 }
  0x93   : > { %v388_v48 = vpop.permute.xlu1 %387 }
  0x94   : > { %v383_v51 = vpop.permute.xlu0 %382 }
  0x97   : > { %v398_v63 = vpop.permute.xlu1 %397 }
  0x98   : > { %v393_v2 = vpop.permute.xlu0 %392 }
  0x9b   : > { %v408_v12 = vpop.permute.xlu1 %407 }
  0x9c   : > { %v403_v16 = vpop.permute.xlu0 %402 }
  0x9f   : > { %v418_v33 = vpop.permute.xlu1 %417 }
  0xeb   : > { %v1617_v43 = vpop.f32.mrb[0].mxu0 }
  0xec   : > { %v2150_v44 = vadd.f32 %v1617_v43, %v358_v40  ;;  %v545_v45 = vpop.f32.mrb[1].mxu0 }
  0xed   : > { %v2152_v46 = vadd.f32 %v545_v45, %v353_v38 }
  0xee   : > { %v625_v47 = vsub.f32 0.0, %v2150_v44 }
  0xef   : > { %v624_v49 = vsub.f32 0.0, %v2152_v46  ;;  %v1620_v50 = vpop.f32.mrb[2].mxu0 }
  0xf0   : > { %v642_v52 = vmul.f32 1.442695, %v625_v47  ;;  %v2156_v53 = vadd.f32 %v1620_v50, %v368_v39  ;;  %v555_v54 = vpop.f32.mrb[3].mxu0 }
  0xf1   : > { %v640_v55 = vmul.f32 1.442695, %v624_v49  ;;  %v2158_v56 = vadd.f32 %v555_v54, %v363_v37  ;;  %v413_v37 = vpop.permute.xlu0 %412 }
  0xf2   : > { %1775 = vpow2.f32 %v642_v52  ;;  %v627_v57 = vsub.f32 0.0, %v2156_v53 }
  0xf3   : > { %1777 = vpow2.f32 %v640_v55  ;;  %v626_v58 = vsub.f32 0.0, %v2158_v56  ;;  %v1623_v59 = vpop.f32.mrb[4].mxu0  ;;  %v428_v55 = vpop.permute.xlu1 %427 }
  0xf4   : > { %v646_v60 = vmul.f32 1.442695, %v627_v57  ;;  %v2162_v61 = vadd.f32 %v1623_v59, %v378_v41  ;;  %v565_v62 = vpop.f32.mrb[5].mxu0 }
  0xf5   : > { %v644_v0 = vmul.f32 1.442695, %v626_v58  ;;  %v2164_v1 = vadd.f32 %v565_v62, %v373_v42 }
  0xf6   : > { %1779 = vpow2.f32 %v646_v60  ;;  %v629_v3 = vsub.f32 0.0, %v2162_v61  ;;  %v423_v60 = vpop.permute.xlu0 %422 }
  0xf7   : > { %1781 = vpow2.f32 %v644_v0  ;;  %v628_v4 = vsub.f32 0.0, %v2164_v1  ;;  %v1626_v5 = vpop.f32.mrb[6].mxu0 }
  0xf8   : > { %v650_v6 = vmul.f32 1.442695, %v629_v3  ;;  %v2168_v7 = vadd.f32 %v1626_v5, %v388_v48  ;;  %v575_v8 = vpop.f32.mrb[7].mxu0 }
  0xf9   : > { %v648_v9 = vmul.f32 1.442695, %v628_v4  ;;  %v2170_v10 = vadd.f32 %v575_v8, %v383_v51 }
  0xfa   : > { %1783 = vpow2.f32 %v650_v6  ;;  %v631_v11 = vsub.f32 0.0, %v2168_v7 }
  0xfb   : > { %1785 = vpow2.f32 %v648_v9  ;;  %v630_v13 = vsub.f32 0.0, %v2170_v10  ;;  %v1629_v14 = vpop.f32.mrb[8].mxu0 }
  0xfc   : > { %v1776_v15 = vpop.eup %1775  ;;  %v654_v17 = vmul.f32 1.442695, %v631_v11  ;;  %v2174_v18 = vadd.f32 %v1629_v14, %v398_v63  ;;  %v585_v19 = vpop.f32.mrb[9].mxu0 }
  0xfd   : > { %v1778_v20 = vpop.eup %1777  ;;  %v673_v21 = vadd.f32 1.0, %v1776_v15  ;;  %v652_v22 = vmul.f32 1.442695, %v630_v13  ;;  %v2176_v23 = vadd.f32 %v585_v19, %v393_v2 }
  0xfe   : > { %v672_v24 = vadd.f32 1.0, %v1778_v20  ;;  %1787 = vpow2.f32 %v654_v17  ;;  %v633_v25 = vsub.f32 0.0, %v2174_v18 }
  0xff   : > { %1789 = vrcp.f32 %v673_v21  ;;  %v632_v26 = vsub.f32 0.0, %v2176_v23  ;;  %v1632_v27 = vpop.f32.mrb[10].mxu0 }
 0x100   : > { %v1780_v28 = vpop.eup %1779  ;;  %1791 = vrcp.f32 %v672_v24  ;;  %v658_v29 = vmul.f32 1.442695, %v633_v25  ;;  %v2180_v30 = vadd.f32 %v1632_v27, %v408_v12  ;;  %v595_v31 = vpop.f32.mrb[11].mxu0 }
 0x101   : > { %v1782_v32 = vpop.eup %1781  ;;  %v675_v34 = vadd.f32 1.0, %v1780_v28  ;;  %1793 = vpow2.f32 %v652_v22  ;;  %v656_v35 = vmul.f32 1.442695, %v632_v26  ;;  %v2182_v36 = vadd.f32 %v595_v31, %v403_v16 }
 0x102   : > { %v674_v38 = vadd.f32 1.0, %v1782_v32  ;;  %1795 = vpow2.f32 %v658_v29  ;;  %v635_v39 = vsub.f32 0.0, %v2180_v30 }
 0x103   : > { %1797 = vrcp.f32 %v675_v34  ;;  %v634_v40 = vsub.f32 0.0, %v2182_v36  ;;  %v1635_v41 = vpop.f32.mrb[12].mxu0 }
 0x104   : > { %v1784_v42 = vpop.eup %1783  ;;  %1799 = vrcp.f32 %v674_v38  ;;  %v662_v43 = vmul.f32 1.442695, %v635_v39  ;;  %v2186_v45 = vadd.f32 %v1635_v41, %v418_v33  ;;  %v605_v47 = vpop.f32.mrb[13].mxu0 }
 0x105   : > { %v1786_v48 = vpop.eup %1785  ;;  %v677_v49 = vadd.f32 1.0, %v1784_v42  ;;  %1801 = vpow2.f32 %v656_v35  ;;  %v660_v50 = vmul.f32 1.442695, %v634_v40  ;;  %v2188_v51 = vadd.f32 %v605_v47, %v413_v37 }
 0x106   : > { %v676_v52 = vadd.f32 1.0, %v1786_v48  ;;  %1803 = vpow2.f32 %v662_v43  ;;  %v637_v54 = vsub.f32 0.0, %v2186_v45 }
 0x107   : > { %1805 = vrcp.f32 %v677_v49  ;;  %v636_v57 = vsub.f32 0.0, %v2188_v51  ;;  %v1638_v58 = vpop.f32.mrb[14].mxu0 }
 0x108   : > { %v1788_v59 = vpop.eup %1787  ;;  %1807 = vrcp.f32 %v676_v52  ;;  %v666_v62 = vmul.f32 1.442695, %v637_v54  ;;  %v2192_v63 = vadd.f32 %v1638_v58, %v428_v55  ;;  %v615_v0 = vpop.f32.mrb[15].mxu0 }
 0x109   : > { %v1790_v2 = vpop.eup %1789  ;;  %v679_v3 = vadd.f32 1.0, %v1788_v59  ;;  %1809 = vpow2.f32 %v660_v50  ;;  %v664_v4 = vmul.f32 1.442695, %v636_v57  ;;  %v2194_v5 = vadd.f32 %v615_v0, %v423_v60 }
 0x10a   : > { %v1792_v6 = vpop.eup %1791  ;;  %v705_v8 = vmul.f32 %v1790_v2, %v2150_v44  ;;  %1811 = vpow2.f32 %v666_v62  ;;  %v639_v9 = vsub.f32 0.0, %v2192_v63 }
 0x10b   : > { %v1794_v11 = vpop.eup %1793  ;;  %v704_v12 = vmul.f32 %v1792_v6, %v2152_v46  ;;  %1813 = vrcp.f32 %v679_v3  ;;  %v638_v13 = vsub.f32 0.0, %v2194_v5 }
 0x10c   : > { %v1796_v14 = vpop.eup %1795  ;;  %v721_v15 = vmax.f32 %v705_v8, 1e-06  ;;  %v678_v16 = vadd.f32 1.0, %v1794_v11  ;;  %1815 = vpow2.f32 %v664_v4  ;;  %v670_v17 = vmul.f32 1.442695, %v639_v9 }
 0x10d   : > { %v1798_v19 = vpop.eup %1797  ;;  %v720_v20 = vmax.f32 %v704_v12, 1e-06  ;;  %v681_v21 = vadd.f32 1.0, %v1796_v14  ;;  %v668_v22 = vmul.f32 1.442695, %v638_v13 }
 0x10e   : > { %v1800_v24 = vpop.eup %1799  ;;  %v707_v44 = vmul.f32 %v1798_v19, %v2156_v53  ;;  %1817 = vrcp.f32 %v678_v16  ;;  %v737_v25 = vmul.f32 %v721_v15, %v721_v15 }
 0x10f   : > { %v1802_v26 = vpop.eup %1801  ;;  %v706_v46 = vmul.f32 %v1800_v24, %v2158_v56  ;;  %1819 = vrcp.f32 %v681_v21  ;;  %v736_v27 = vmul.f32 %v720_v20, %v720_v20 }
 0x110   : > { %v1804_v28 = vpop.eup %1803  ;;  %v723_v29 = vmax.f32 %v707_v44, 1e-06  ;;  %v680_v31 = vadd.f32 1.0, %v1802_v26  ;;  %1821 = vpow2.f32 %v670_v17  ;;  %v753_v32 = vmul.f32 %v737_v25, %v721_v15 }
 0x111   : > { %v1806_v33 = vpop.eup %1805  ;;  %v722_v34 = vmax.f32 %v706_v46, 1e-06  ;;  %v683_v35 = vadd.f32 1.0, %v1804_v28  ;;  %1823 = vpow2.f32 %v668_v22  ;;  %v752_v37 = vmul.f32 %v736_v27, %v720_v20 }
 0x112   : > { %v1808_v38 = vpop.eup %1807  ;;  %v709_v53 = vmul.f32 %v1806_v33, %v2162_v61  ;;  %1825 = vrcp.f32 %v680_v31  ;;  %v788_v39 = vsel %vm784_vm2, %v753_v32, 0.0  ;;  %v739_v56 = vmul.f32 %v723_v29, %v723_v29 }
 0x113   : > { %v1810_v40 = vpop.eup %1809  ;;  %v708_v41 = vmul.f32 %v1808_v38, %v2164_v1  ;;  %1827 = vrcp.f32 %v683_v35  ;;  %789 = vadd.xlane.f32.xlu1 %v788_v39  ;;  %v785_v42 = vsel %vm784_vm2, %v752_v37, 0.0  ;;  %v738_v43 = vmul.f32 %v722_v34, %v722_v34 }
 0x114   : > { %v1812_v47 = vpop.eup %1811  ;;  %v725_v48 = vmax.f32 %v709_v53, 1e-06  ;;  %v682_v49 = vadd.f32 1.0, %v1810_v40  ;;  %786 = vadd.xlane.f32.xlu0 %v785_v42  ;;  %v755_v50 = vmul.f32 %v739_v56, %v723_v29 }
 0x115   : > { %v1814_v52 = vpop.eup %1813  ;;  %v724_v54 = vmax.f32 %v708_v41, 1e-06  ;;  %v685_v61 = vadd.f32 1.0, %v1812_v47  ;;  %v754_v1 = vmul.f32 %v738_v43, %v722_v34 }
 0x116   : > { %v1816_v55 = vpop.eup %1815  ;;  %v711_v57 = vmul.f32 %v1814_v52, %v2168_v7  ;;  %1829 = vrcp.f32 %v682_v49  ;;  %v794_v58 = vsel %vm784_vm2, %v755_v50, 0.0  ;;  %v741_v62 = vmul.f32 %v725_v48, %v725_v48 }
 0x117   : > { %1831 = vrcp.f32 %v685_v61  ;;  %v684_v59 = vadd.f32 1.0, %v1816_v55  ;;  %v740_v60 = vmul.f32 %v724_v54, %v724_v54  ;;  %v791_v7 = vsel %vm784_vm2, %v754_v1, 0.0 }
 0x118   : > { %v1818_v0 = vpop.eup %1817  ;;  %v727_v2 = vmax.f32 %v711_v57, 1e-06  ;;  %795 = vadd.xlane.f32.xlu0 %v794_v58  ;;  %v757_v16 = vmul.f32 %v741_v62, %v725_v48 }
 0x119   : > { %v1820_v3 = vpop.eup %1819  ;;  %v710_v4 = vmul.f32 %v1818_v0, %v2170_v10  ;;  %1833 = vrcp.f32 %v684_v59  ;;  %v756_v6 = vmul.f32 %v740_v60, %v724_v54 }
 0x11a   : > { %v1822_v8 = vpop.eup %1821  ;;  %v713_v9 = vmul.f32 %v1820_v3, %v2174_v18  ;;  %v743_v11 = vmul.f32 %v727_v2, %v727_v2  ;;  %v800_v26 = vsel %vm784_vm2, %v757_v16, 0.0 }
 0x11b   : > { %v1824_v12 = vpop.eup %1823  ;;  %v726_v13 = vmax.f32 %v710_v4, 1e-06  ;;  %v687_v14 = vadd.f32 1.0, %v1822_v8  ;;  %v797_v15 = vsel %vm784_vm2, %v756_v6, 0.0  ;;  %v981_v4 = vld [vmem:[%s2592_s3] sm:$0xff]  ;;  %v987_v6 = vld [vmem:[%s2592_s3 + $0x30] sm:$0xff] }
 0x11c   : > { %v1826_v17 = vpop.eup %1825  ;;  %v729_v19 = vmax.f32 %v713_v9, 1e-06  ;;  %v686_v20 = vadd.f32 1.0, %v1824_v12  ;;  %798 = vadd.xlane.f32.xlu1 %v797_v15  ;;  %792 = vadd.xlane.f32.xlu0 %v791_v7  ;;  %v759_v24 = vmul.f32 %v743_v11, %v727_v2  ;;  %v769_v8 = vld [vmem:[#allocation2 + $0x8] sm:$0xff]  ;;  %v768_v9 = vld [vmem:[#allocation2] sm:$0xff] }
 0x11d   : > { %v1828_v10 = vpop.eup %1827  ;;  %v712_v21 = vmul.f32 %v1826_v17, %v2176_v23  ;;  %1835 = vrcp.f32 %v687_v14  ;;  %v742_v22 = vmul.f32 %v726_v13, %v726_v13  ;;  %1671 = vmatprep.mubr.f32.mxu0 %v981_v4  ;;  %1680 = vmatprep.mubr.f32.mxu1 %v987_v6  ;;  %v771_v14 = vld [vmem:[#allocation2 + $0x18] sm:$0xff]  ;;  %v772_v17 = vld [vmem:[#allocation2 + $0x20] sm:$0xff] }
 0x11e   : > { %v715_v18 = vmul.f32 %v1828_v10, %v2180_v30  ;;  %1837 = vrcp.f32 %v686_v20  ;;  %v745_v46 = vmul.f32 %v729_v19, %v729_v19  ;;  %v806_v30 = vsel %vm784_vm2, %v759_v24, 0.0  ;;  %v773_v24 = vld [vmem:[#allocation2 + $0x28] sm:$0xff] }
 0x11f   : > { %v728_v44 = vmax.f32 %v712_v21, 1e-06  ;;  %v758_v25 = vmul.f32 %v742_v22, %v726_v13 }
 0x120   : > { %v1830_v27 = vpop.eup %1829  ;;  %v731_v28 = vmax.f32 %v715_v18, 1e-06  ;;  %801 = vadd.xlane.f32.xlu0 %v800_v26  ;;  %v761_v38 = vmul.f32 %v745_v46, %v729_v19  ;;  %v770_v19 = vld [vmem:[#allocation2 + $0x10] sm:$0xff] }
 0x121   : > { %v1832_v29 = vpop.eup %1831  ;;  %v714_v31 = vmul.f32 %v1830_v27, %v2182_v36  ;;  %v803_v32 = vsel %vm784_vm2, %v758_v25, 0.0  ;;  %v744_v23 = vmul.f32 %v728_v44, %v728_v44  ;;  %v774_v46 = vld [vmem:[#allocation2 + $0x30] sm:$0xff] }
 0x122   : > { %v717_v33 = vmul.f32 %v1832_v29, %v2186_v45  ;;  %804 = vadd.xlane.f32.xlu1 %v803_v32  ;;  %v747_v53 = vmul.f32 %v731_v28, %v731_v28  ;;  %v812_v45 = vsel %vm784_vm2, %v761_v38, 0.0  ;;  %v777_v38 = vld [vmem:[#allocation2 + $0x48] sm:$0xff] }
 0x123   : > { %v1834_v34 = vpop.eup %1833  ;;  %v730_v35 = vmax.f32 %v714_v31, 1e-06  ;;  %v760_v37 = vmul.f32 %v744_v23, %v728_v44  ;;  %v775_v31 = vld [vmem:[#allocation2 + $0x38] sm:$0xff] }
 0x124   : > { %v733_v39 = vmax.f32 %v717_v33, 1e-06  ;;  %v716_v56 = vmul.f32 %v1834_v34, %v2188_v51  ;;  %807 = vadd.xlane.f32.xlu0 %v806_v30  ;;  %v763_v47 = vmul.f32 %v747_v53, %v731_v28  ;;  %v776_v30 = vld [vmem:[#allocation2 + $0x40] sm:$0xff] }
 0x125   : > { %v809_v40 = vsel %vm784_vm2, %v760_v37, 0.0  ;;  %v746_v36 = vmul.f32 %v730_v35, %v730_v35 }
 0x126   : > { %v732_v41 = vmax.f32 %v716_v56, 1e-06  ;;  %810 = vadd.xlane.f32.xlu1 %v809_v40  ;;  %v749_v48 = vmul.f32 %v733_v39, %v733_v39  ;;  %v818_v58 = vsel %vm784_vm2, %v763_v47, 0.0 }
 0x127   : > { %v1836_v42 = vpop.eup %1835  ;;  %v762_v43 = vmul.f32 %v746_v36, %v730_v35 }
 0x128   : > { %v1838_v49 = vpop.eup %1837  ;;  %v719_v50 = vmul.f32 %v1836_v42, %v2192_v63  ;;  %813 = vadd.xlane.f32.xlu0 %v812_v45  ;;  %v748_v52 = vmul.f32 %v732_v41, %v732_v41  ;;  %v765_v1 = vmul.f32 %v749_v48, %v733_v39  ;;  %v779_v48 = vld [vmem:[#allocation2 + $0x58] sm:$0xff] }
 0x129   : > { %v718_v54 = vmul.f32 %v1838_v49, %v2194_v5  ;;  %v815_v51 = vsel %vm784_vm2, %v762_v43, 0.0 }
 0x12a   : > { %v735_v61 = vmax.f32 %v719_v50, 1e-06  ;;  %816 = vadd.xlane.f32.xlu1 %v815_v51  ;;  %v764_v55 = vmul.f32 %v748_v52, %v732_v41  ;;  %v824_v0 = vsel %vm784_vm2, %v765_v1, 0.0  ;;  %v778_v41 = vld [vmem:[#allocation2 + $0x50] sm:$0xff] }
 0x12b   : > { %v734_v57 = vmax.f32 %v718_v54, 1e-06 }
 0x12c   : > { %v821_v59 = vsel %vm784_vm2, %v764_v55, 0.0  ;;  %819 = vadd.xlane.f32.xlu0 %v818_v58  ;;  %v751_v60 = vmul.f32 %v735_v61, %v735_v61 }
 0x12d   : > { %v750_v62 = vmul.f32 %v734_v57, %v734_v57 }
 0x12e   : > { %822 = vadd.xlane.f32.xlu1 %v821_v59  ;;  %v767_v2 = vmul.f32 %v751_v60, %v735_v61  ;;  %v780_v61 = vld [vmem:[#allocation2 + $0x60] sm:$0xff] }
 0x12f   : > { %v766_v63 = vmul.f32 %v750_v62, %v734_v57 }
 0x130   : > { %825 = vadd.xlane.f32.xlu0 %v824_v0  ;;  %v830_v3 = vsel %vm784_vm2, %v767_v2, 0.0 }
 0x131   : > { %v827_v5 = vsel %vm784_vm2, %v766_v63, 0.0  ;;  %v781_v63 = vld [vmem:[#allocation2 + $0x68] sm:$0xff] }
 0x132   : > { %828 = vadd.xlane.f32.xlu1 %v827_v5 }
 0x134   : > { %831 = vadd.xlane.f32.xlu0 %v830_v3 }
 0x1a0   : > { %v790_v7 = vpop.xlane.xlu1 %789 }
 0x1a1   : > { %v834_v11 = vadd.f32 %v790_v7, %v769_v8  ;;  %v787_v12 = vpop.xlane.xlu0 %786  ;;  %v782_v8 = vld [vmem:[#allocation2 + $0x70] sm:$0xff] }
 0x1a2   : > { %v833_v13 = vadd.f32 %v787_v12, %v768_v9 }
 0x1a3   : > { %851 = vst.msk [vmem:[#allocation2 + $0x8] sm:$0xff] %vm299_vm1, %v834_v11 }
 0x1a4   : > { %850 = vst.msk [vmem:[#allocation2] sm:$0xff] %vm299_vm1, %v833_v13 }
 0x1a5   : > { %v796_v15 = vpop.xlane.xlu0 %795 }
 0x1a6   : > { %v836_v16 = vadd.f32 %v796_v15, %v771_v14 }
 0x1a8   : > { %853 = vst.msk [vmem:[#allocation2 + $0x18] sm:$0xff] %vm299_vm1, %v836_v16  ;;  %v783_v16 = vld [vmem:[#allocation2 + $0x78] sm:$0xff] }
 0x1a9   : > { %v799_v20 = vpop.xlane.xlu1 %798  ;;  %v793_v10 = vpop.xlane.xlu0 %792 }
 0x1aa   : > { %v837_v21 = vadd.f32 %v799_v20, %v772_v17  ;;  %v835_v22 = vadd.f32 %v793_v10, %v770_v19  ;;  %v870_v18 = vld [vmem:[#allocation2 + $0x8] sm:$0xff] }
 0x1ab   : > { %v869_v44 = vld [vmem:[#allocation2] sm:$0xff]  ;;  %v886_v25 = vmul.f32 0.015625, %v870_v18 }
 0x1ac   : > { %854 = vst.msk [vmem:[#allocation2 + $0x20] sm:$0xff] %vm299_vm1, %v837_v21  ;;  %852 = vst.msk [vmem:[#allocation2 + $0x10] sm:$0xff] %vm299_vm1, %v835_v22  ;;  %v885_v26 = vmul.f32 0.015625, %v869_v44 }
 0x1ad   : > { %v802_v27 = vpop.xlane.xlu0 %801  ;;  %1839 = vlog2.f32 %v886_v25 }
 0x1ae   : > { %v838_v28 = vadd.f32 %v802_v27, %v773_v24  ;;  %1841 = vlog2.f32 %v885_v26 }
 0x1af   : > { %v805_v29 = vpop.xlane.xlu1 %804  ;;  %v872_v32 = vld [vmem:[#allocation2 + $0x18] sm:$0xff] }
 0x1b0   : > { %v839_v23 = vadd.f32 %v805_v29, %v774_v46  ;;  %855 = vst.msk [vmem:[#allocation2 + $0x28] sm:$0xff] %vm299_vm1, %v838_v28  ;;  %v888_v33 = vmul.f32 0.015625, %v872_v32 }
 0x1b1   : > { %v808_v34 = vpop.xlane.xlu0 %807 }
 0x1b2   : > { %856 = vst.msk [vmem:[#allocation2 + $0x30] sm:$0xff] %vm299_vm1, %v839_v23  ;;  %v840_v35 = vadd.f32 %v808_v34, %v775_v31  ;;  %1843 = vlog2.f32 %v888_v33 }
 0x1b3   : > { %v811_v37 = vpop.xlane.xlu1 %810  ;;  %v871_v53 = vld [vmem:[#allocation2 + $0x10] sm:$0xff]  ;;  %v873_v39 = vld [vmem:[#allocation2 + $0x20] sm:$0xff] }
 0x1b4   : > { %v841_v56 = vadd.f32 %v811_v37, %v776_v30  ;;  %857 = vst.msk [vmem:[#allocation2 + $0x38] sm:$0xff] %vm299_vm1, %v840_v35  ;;  %v887_v40 = vmul.f32 0.015625, %v871_v53  ;;  %v889_v36 = vmul.f32 0.015625, %v873_v39 }
 0x1b5   : > { %v814_v42 = vpop.xlane.xlu0 %813 }
 0x1b6   : > { %858 = vst.msk [vmem:[#allocation2 + $0x40] sm:$0xff] %vm299_vm1, %v841_v56  ;;  %v842_v43 = vadd.f32 %v814_v42, %v777_v38  ;;  %1845 = vlog2.f32 %v887_v40 }
 0x1b7   : > { %v1840_v45 = vpop.eup %1839  ;;  %v817_v47 = vpop.xlane.xlu1 %816  ;;  %v874_v49 = vld [vmem:[#allocation2 + $0x28] sm:$0xff]  ;;  %1847 = vlog2.f32 %v889_v36 }
 0x1b8   : > { %v1842_v50 = vpop.eup %1841  ;;  %v843_v52 = vadd.f32 %v817_v47, %v778_v41  ;;  %859 = vst.msk [vmem:[#allocation2 + $0x48] sm:$0xff] %vm299_vm1, %v842_v43  ;;  %v904_v54 = vmul.f32 0.6931472, %v1840_v45  ;;  %v890_v51 = vmul.f32 0.015625, %v874_v49 }
 0x1b9   : > { %v820_v55 = vpop.xlane.xlu0 %819  ;;  %v902_v57 = vmul.f32 0.6931472, %v1842_v50  ;;  %v875_v58 = vld [vmem:[#allocation2 + $0x30] sm:$0xff] }
 0x1ba   : > { %860 = vst.msk [vmem:[#allocation2 + $0x50] sm:$0xff] %vm299_vm1, %v843_v52  ;;  %v844_v1 = vadd.f32 %v820_v55, %v779_v48  ;;  %v934_v59 = vmul.f32 0.33333334, %v904_v54  ;;  %1849 = vlog2.f32 %v890_v51  ;;  %v891_v60 = vmul.f32 0.015625, %v875_v58 }
 0x1bb   : > { %v823_v62 = vpop.xlane.xlu1 %822  ;;  %v933_v0 = vmul.f32 0.33333334, %v902_v57  ;;  %v876_v2 = vld [vmem:[#allocation2 + $0x38] sm:$0xff] }
 0x1bc   : > { %v1844_v5 = vpop.eup %1843  ;;  %v845_v3 = vadd.f32 %v823_v62, %v780_v61  ;;  %861 = vst.msk [vmem:[#allocation2 + $0x58] sm:$0xff] %vm299_vm1, %v844_v1  ;;  %v951_v4 = vmul.f32 1.442695, %v934_v59  ;;  %v892_v6 = vmul.f32 0.015625, %v876_v2  ;;  %1851 = vlog2.f32 %v891_v60 }
 0x1bd   : > { %v826_v9 = vpop.xlane.xlu0 %825  ;;  %v949_v7 = vmul.f32 1.442695, %v933_v0  ;;  %v908_v11 = vmul.f32 0.6931472, %v1844_v5  ;;  %v877_v12 = vld [vmem:[#allocation2 + $0x40] sm:$0xff] }
 0x1be   : > { %862 = vst.msk [vmem:[#allocation2 + $0x60] sm:$0xff] %vm299_vm1, %v845_v3  ;;  %v846_v13 = vadd.f32 %v826_v9, %v781_v63  ;;  %1853 = vpow2.f32 %v951_v4  ;;  %v893_v14 = vmul.f32 0.015625, %v877_v12 }
 0x1bf   : > { %v829_v15 = vpop.xlane.xlu1 %828  ;;  %1855 = vpow2.f32 %v949_v7  ;;  %v936_v17 = vmul.f32 0.33333334, %v908_v11  ;;  %v878_v19 = vld [vmem:[#allocation2 + $0x48] sm:$0xff] }
 0x1c0   : > { %v1846_v20 = vpop.eup %1845  ;;  %v847_v10 = vadd.f32 %v829_v15, %v782_v8  ;;  %863 = vst.msk [vmem:[#allocation2 + $0x68] sm:$0xff] %vm299_vm1, %v846_v13  ;;  %1857 = vlog2.f32 %v892_v6  ;;  %v894_v21 = vmul.f32 0.015625, %v878_v19 }
 0x1c1   : > { %v1848_v22 = vpop.eup %1847  ;;  %v832_v18 = vpop.xlane.xlu0 %831  ;;  %v906_v24 = vmul.f32 0.6931472, %v1846_v20  ;;  %v955_v44 = vmul.f32 1.442695, %v936_v17  ;;  %1859 = vlog2.f32 %v893_v14  ;;  %v879_v25 = vld [vmem:[#allocation2 + $0x50] sm:$0xff] }
 0x1c2   : > { %864 = vst.msk [vmem:[#allocation2 + $0x70] sm:$0xff] %vm299_vm1, %v847_v10  ;;  %v848_v26 = vadd.f32 %v832_v18, %v783_v16  ;;  %v910_v46 = vmul.f32 0.6931472, %v1848_v22  ;;  %1861 = vlog2.f32 %v894_v21  ;;  %v895_v27 = vmul.f32 0.015625, %v879_v25 }
 0x1c3   : > { %v935_v28 = vmul.f32 0.33333334, %v906_v24  ;;  %v880_v29 = vld [vmem:[#allocation2 + $0x58] sm:$0xff] }
 0x1c4   : > { %v1850_v31 = vpop.eup %1849  ;;  %865 = vst.msk [vmem:[#allocation2 + $0x78] sm:$0xff] %vm299_vm1, %v848_v26  ;;  %v937_v32 = vmul.f32 0.33333334, %v910_v46  ;;  %v896_v23 = vmul.f32 0.015625, %v880_v29  ;;  %1863 = vlog2.f32 %v895_v27 }
 0x1c5   : > { %v953_v33 = vmul.f32 1.442695, %v935_v28  ;;  %1865 = vpow2.f32 %v955_v44  ;;  %v912_v30 = vmul.f32 0.6931472, %v1850_v31  ;;  %v881_v34 = vld [vmem:[#allocation2 + $0x60] sm:$0xff] }
 0x1c6   : > { %v1852_v35 = vpop.eup %1851  ;;  %v957_v37 = vmul.f32 1.442695, %v937_v32  ;;  %1867 = vlog2.f32 %v896_v23  ;;  %v897_v38 = vmul.f32 0.015625, %v881_v34 }
 0x1c7   : > { %1869 = vpow2.f32 %v953_v33  ;;  %v938_v53 = vmul.f32 0.33333334, %v912_v30  ;;  %v914_v39 = vmul.f32 0.6931472, %v1852_v35  ;;  %v882_v56 = vld [vmem:[#allocation2 + $0x68] sm:$0xff] }
 0x1c8   : > { %v1854_v40 = vpop.eup %1853  ;;  %1871 = vpow2.f32 %v957_v37  ;;  %v898_v36 = vmul.f32 0.015625, %v882_v56 }
 0x1c9   : > { %v1856_v41 = vpop.eup %1855  ;;  %v959_v42 = vmul.f32 1.442695, %v938_v53  ;;  %v939_v43 = vmul.f32 0.33333334, %v914_v39  ;;  %1873 = vlog2.f32 %v897_v38  ;;  %v883_v45 = vld [vmem:[#allocation2 + $0x70] sm:$0xff] }
 0x1ca   : > { %v1858_v47 = vpop.eup %1857  ;;  %v1699_v48 = vpack.c.bf16 %v1854_v40, %v1856_v41  ;;  %1875 = vlog2.f32 %v898_v36  ;;  %v899_v49 = vmul.f32 0.015625, %v883_v45  ;;  %v988_v45 = vld [vmem:[%s2592_s3 + $0x38] sm:$0xff] }
 0x1cb   : > { %v1860_v50 = vpop.eup %1859  ;;  %1877 = vpow2.f32 %v959_v42  ;;  %v916_v52 = vmul.f32 0.6931472, %v1858_v47  ;;  %v884_v54 = vld [vmem:[#allocation2 + $0x78] sm:$0xff]  ;;  %v961_v61 = vmul.f32 1.442695, %v939_v43  ;;  %v982_v43 = vld [vmem:[%s2592_s3 + $0x8] sm:$0xff] }
 0x1cc   : > { %v1862_v51 = vpop.eup %1861  ;;  %1700 = vmatprep.subr.bf16.mxu0 %v1699_v48  ;;  %1731 = vmatprep.subr.bf16.mxu1 %v1699_v48  ;;  %v918_v55 = vmul.f32 0.6931472, %v1860_v50  ;;  %v900_v57 = vmul.f32 0.015625, %v884_v54  ;;  %1879 = vlog2.f32 %v899_v49  ;;  %v983_v47 = vld [vmem:[%s2592_s3 + $0x10] sm:$0xff]  ;;  %v984_v49 = vld [vmem:[%s2592_s3 + $0x18] sm:$0xff]  ;;  %v990_v50 = vld [vmem:[%s2592_s3 + $0x48] sm:$0xff] }
 0x1cd   : > { %1702 = vmatpush3.bf16.msra.mxu0 %v1699_v48  ;;  %1739 = vmatpush3.bf16.msra.mxu1 %v1699_v48  ;;  %v940_v58 = vmul.f32 0.33333334, %v916_v52  ;;  %v920_v1 = vmul.f32 0.6931472, %v1862_v51  ;;  %v989_v48 = vld [vmem:[%s2592_s3 + $0x40] sm:$0xff]  ;;  %v991_v54 = vld [vmem:[%s2592_s3 + $0x50] sm:$0xff] }
 0x1ce   : > { %v1864_v59 = vpop.eup %1863  ;;  %v941_v60 = vmul.f32 0.33333334, %v918_v55  ;;  %1881 = vlog2.f32 %v900_v57  ;;  %v985_v52 = vld [vmem:[%s2592_s3 + $0x20] sm:$0xff]  ;;  %v986_v51 = vld [vmem:[%s2592_s3 + $0x28] sm:$0xff] }
 0x1cf   : > { %v1866_v62 = vpop.eup %1865  ;;  %v963_v63 = vmul.f32 1.442695, %v940_v58  ;;  %v942_v0 = vmul.f32 0.33333334, %v920_v1  ;;  %v922_v2 = vmul.f32 0.6931472, %v1864_v59  ;;  %1883 = vpow2.f32 %v961_v61 }
 0x1d0   : > { %v1868_v5 = vpop.eup %1867  ;;  %v965_v3 = vmul.f32 1.442695, %v941_v60  ;;  %v992_v61 = vld [vmem:[%s2592_s3 + $0x58] sm:$0xff]  ;;  %v993_v55 = vld [vmem:[%s2592_s3 + $0x60] sm:$0xff]  ;;  %v994_v57 = vld [vmem:[%s2592_s3 + $0x68] sm:$0xff] }
 0x1d1   : > { %v1870_v4 = vpop.eup %1869  ;;  %1885 = vpow2.f32 %v963_v63  ;;  %v967_v6 = vmul.f32 1.442695, %v942_v0  ;;  %v924_v8 = vmul.f32 0.6931472, %v1868_v5  ;;  %v943_v9 = vmul.f32 0.33333334, %v922_v2 }
 0x1d2   : > { %v1872_v7 = vpop.eup %1871  ;;  %v1703_v11 = vpack.c.bf16 %v1866_v62, %v1870_v4  ;;  %1887 = vpow2.f32 %v965_v3  ;;  %v995_v58 = vld [vmem:[%s2592_s3 + $0x70] sm:$0xff]  ;;  %v996_v1 = vld [vmem:[%s2592_s3 + $0x78] sm:$0xff]  ;;  %v998_v60 = vld [vmem:[%s2593_s4 + $0x8] sm:$0xff] }
 0x1d3   : > { %v1874_v12 = vpop.eup %1873  ;;  %1889 = vpow2.f32 %v967_v6  ;;  %v944_v13 = vmul.f32 0.33333334, %v924_v8  ;;  %v969_v14 = vmul.f32 1.442695, %v943_v9  ;;  %v1004_v59 = vld [vmem:[%s2593_s4 + $0x38] sm:$0xff]  ;;  %v1003_v62 = vld [vmem:[%s2593_s4 + $0x30] sm:$0xff] }
 0x1d4   : > { %v1876_v15 = vpop.eup %1875  ;;  %1704 = vmatprep.subr.bf16.mxu0 %v1703_v11  ;;  %1732 = vmatprep.subr.bf16.mxu1 %v1703_v11  ;;  %v926_v16 = vmul.f32 0.6931472, %v1874_v12  ;;  %v1000_v8 = vld [vmem:[%s2593_s4 + $0x18] sm:$0xff]  ;;  %v1006_v9 = vld [vmem:[%s2593_s4 + $0x48] sm:$0xff]  ;;  %v997_v12 = vld [vmem:[%s2593_s4] sm:$0xff] }
 0x1d5   : > { %v1878_v17 = vpop.eup %1877  ;;  %1706 = vmatpush3.bf16.msra.mxu0 %v1703_v11  ;;  %1740 = vmatpush3.bf16.msra.mxu1 %v1703_v11  ;;  %v971_v19 = vmul.f32 1.442695, %v944_v13  ;;  %v928_v20 = vmul.f32 0.6931472, %v1876_v15  ;;  %1891 = vpow2.f32 %v969_v14  ;;  %v1005_v11 = vld [vmem:[%s2593_s4 + $0x40] sm:$0xff] }
 0x1d6   : > { %v1880_v10 = vpop.eup %1879  ;;  %v1707_v21 = vpack.c.bf16 %v1878_v17, %v1872_v7  ;;  %v945_v22 = vmul.f32 0.33333334, %v926_v16  ;;  %v999_v7 = vld [vmem:[%s2593_s4 + $0x10] sm:$0xff] }
 0x1d7   : > { %1893 = vpow2.f32 %v971_v19  ;;  %v946_v18 = vmul.f32 0.33333334, %v928_v20  ;;  %v930_v24 = vmul.f32 0.6931472, %v1880_v10 }
 0x1d8   : > { %v1882_v44 = vpop.eup %1881  ;;  %1708 = vmatprep.subr.bf16.mxu0 %v1707_v21  ;;  %1733 = vmatprep.subr.bf16.mxu1 %v1707_v21  ;;  %v973_v25 = vmul.f32 1.442695, %v945_v22  ;;  %v1008_v22 = vld [vmem:[%s2593_s4 + $0x58] sm:$0xff] }
 0x1d9   : > { %1710 = vmatpush3.bf16.msra.mxu0 %v1707_v21  ;;  %1741 = vmatpush3.bf16.msra.mxu1 %v1707_v21  ;;  %v975_v26 = vmul.f32 1.442695, %v946_v18  ;;  %v932_v46 = vmul.f32 0.6931472, %v1882_v44  ;;  %v947_v27 = vmul.f32 0.33333334, %v930_v24  ;;  %v1884_v28 = vpop.eup %1883 }
 0x1da   : > { %1895 = vpow2.f32 %v973_v25  ;;  %v1002_v21 = vld [vmem:[%s2593_s4 + $0x28] sm:$0xff]  ;;  %v1001_v25 = vld [vmem:[%s2593_s4 + $0x20] sm:$0xff] }
 0x1db   : > { %v1886_v29 = vpop.eup %1885  ;;  %1897 = vpow2.f32 %v975_v26  ;;  %v948_v31 = vmul.f32 0.33333334, %v932_v46  ;;  %v977_v32 = vmul.f32 1.442695, %v947_v27  ;;  %v1007_v26 = vld [vmem:[%s2593_s4 + $0x50] sm:$0xff] }
 0x1dc   : > { %v1888_v23 = vpop.eup %1887  ;;  %v1711_v33 = vpack.c.bf16 %v1886_v29, %v1884_v28 }
 0x1dd   : > { %v1890_v30 = vpop.eup %1889  ;;  %v979_v34 = vmul.f32 1.442695, %v948_v31  ;;  %1899 = vpow2.f32 %v977_v32 }
 0x1de   : > { %1712 = vmatprep.subr.bf16.mxu0 %v1711_v33  ;;  %1734 = vmatprep.subr.bf16.mxu1 %v1711_v33  ;;  %v1715_v35 = vpack.c.bf16 %v1890_v30, %v1888_v23 }
 0x1df   : > { %1714 = vmatpush3.bf16.msra.mxu0 %v1711_v33  ;;  %1742 = vmatpush3.bf16.msra.mxu1 %v1711_v33  ;;  %1901 = vpow2.f32 %v979_v34  ;;  %v1892_v37 = vpop.eup %1891 }
 0x1e0   : > { %1716 = vmatprep.subr.bf16.mxu0 %v1715_v35  ;;  %1735 = vmatprep.subr.bf16.mxu1 %v1715_v35 }
 0x1e1   : > { %v1894_v38 = vpop.eup %1893 }
 0x1e2   : > { %v1719_v53 = vpack.c.bf16 %v1894_v38, %v1892_v37  ;;  %v1010_v38 = vld [vmem:[%s2593_s4 + $0x68] sm:$0xff] }
 0x1e3   : > { %1718 = vmatpush3.bf16.msra.mxu0 %v1715_v35  ;;  %1743 = vmatpush3.bf16.msra.mxu1 %v1715_v35 }
 0x1e4   : > { %v1896_v39 = vpop.eup %1895  ;;  %1720 = vmatprep.subr.bf16.mxu0 %v1719_v53  ;;  %1736 = vmatprep.subr.bf16.mxu1 %v1719_v53 }
 0x1e5   : > { %v1898_v56 = vpop.eup %1897 }
 0x1e6   : > { %v1723_v40 = vpack.c.bf16 %v1898_v56, %v1896_v39 }
 0x1e7   : > { %1722 = vmatpush3.bf16.msra.mxu0 %v1719_v53  ;;  %1744 = vmatpush3.bf16.msra.mxu1 %v1719_v53  ;;  %v1900_v36 = vpop.eup %1899 }
 0x1e8   : > { %1724 = vmatprep.subr.bf16.mxu0 %v1723_v40  ;;  %1737 = vmatprep.subr.bf16.mxu1 %v1723_v40 }
 0x1e9   : > { %v1902_v41 = vpop.eup %1901 }
 0x1ea   : > { %v1727_v42 = vpack.c.bf16 %v1902_v41, %v1900_v36  ;;  %v1009_v36 = vld [vmem:[%s2593_s4 + $0x60] sm:$0xff] }
 0x1eb   : > { %1726 = vmatpush3.bf16.msra.mxu0 %v1723_v40  ;;  %1745 = vmatpush3.bf16.msra.mxu1 %v1723_v40 }
 0x1ec   : > { %1728 = vmatprep.subr.bf16.mxu0 %v1727_v42  ;;  %1738 = vmatprep.subr.bf16.mxu1 %v1727_v42 }
 0x1ef   : > { %1730 = vmatpush3.bf16.msra.mxu0 %v1727_v42  ;;  %1746 = vmatpush3.bf16.msra.mxu1 %v1727_v42 }
 0x1f2   : > { %1672 = vmatmul.mubr.f32.vlgmr.msra.gmra.mrb[16].mxu0 %v982_v43  ;;  %1681 = vmatmul.mubr.f32.vlgmr.msra.gmra.mrb[0].mxu1 %v988_v45 }
 0x1f3   : > { %1674 = vmatprep.mubr.f32.mxu0 %v983_v47  ;;  %1683 = vmatprep.mubr.f32.mxu1 %v989_v48 }
 0x1f6   : > { %1675 = vmatmul.mubr.f32.gmra.mrb[18].mxu0 %v984_v49  ;;  %1684 = vmatmul.mubr.f32.gmra.mrb[2].mxu1 %v990_v50 }
 0x1f7   : > { %1677 = vmatprep.mubr.f32.mxu0 %v985_v52  ;;  %1686 = vmatprep.mubr.f32.mxu1 %v991_v54 }
 0x1fa   : > { %1678 = vmatmul.mubr.f32.gmra.mrb[20].mxu0 %v986_v51  ;;  %1687 = vmatmul.mubr.f32.gmra.mrb[4].mxu1 %v992_v61 }
 0x1fb   : > { %1689 = vmatprep.mubr.f32.mxu1 %v993_v55 }
 0x1fe   : > { %1690 = vmatmul.mubr.f32.gmra.mrb[6].mxu1 %v994_v57  ;;  %v1012_v57 = vld [vmem:[%s2593_s4 + $0x78] sm:$0xff] }
 0x1ff   : > { %1692 = vmatprep.mubr.f32.mxu1 %v995_v58 }
 0x202   : > { %1693 = vmatmul.mubr.f32.gmra.mrb[8].mxu1 %v996_v1 }
 0x2c5   : > { %v1682_v63 = vpop.f32.mrb[0].mxu1  ;;  %v1673_v0 = vpop.f32.mrb[16].mxu0 }
 0x2c6   : > { %v2311_v2 = vadd.f32 %v1682_v63, %v1004_v59  ;;  %v1109_v5 = vpop.f32.mrb[1].mxu1  ;;  %v2313_v3 = vadd.f32 %v1673_v0, %v998_v60  ;;  %v1079_v4 = vpop.f32.mrb[17].mxu0  ;;  %v1011_v59 = vld [vmem:[%s2593_s4 + $0x70] sm:$0xff] }
 0x2c7   : > { %v2315_v6 = vadd.f32 %v1109_v5, %v1003_v62  ;;  %v2357_v24 = vadd.f32 %v1079_v4, %v997_v12 }
 0x2c8   : > { %1439 = vst.msk [vmem:[%s2309_s10 + $0x38] sm:$0xff] %vm299_vm1, %v2311_v2  ;;  %1433 = vst.msk [vmem:[%s2309_s10 + $0x8] sm:$0xff] %vm299_vm1, %v2313_v3  ;;  %v1168_v18 = vsel %vm299_vm1, %v2311_v2, -inf  ;;  %v1159_v53 = vsel %vm299_vm1, %v2313_v3, -inf }
 0x2c9   : > { %1438 = vst.msk [vmem:[%s2309_s10 + $0x30] sm:$0xff] %vm299_vm1, %v2315_v6  ;;  %v1676_v13 = vpop.f32.mrb[18].mxu0  ;;  %v1685_v14 = vpop.f32.mrb[2].mxu1  ;;  %v1166_v46 = vsel %vm299_vm1, %v2315_v6, -inf  ;;  %v1158_v39 = vsel %vm299_vm1, %v2357_v24, -inf }
 0x2ca   : > { %v2341_v15 = vadd.f32 %v1676_v13, %v1000_v8  ;;  %v2343_v16 = vadd.f32 %v1685_v14, %v1006_v9  ;;  %v1089_v17 = vpop.f32.mrb[19].mxu0  ;;  %v1119_v19 = vpop.f32.mrb[3].mxu1 }
 0x2cb   : > { %v2345_v20 = vadd.f32 %v1089_v17, %v999_v7  ;;  %v2347_v10 = vadd.f32 %v1119_v19, %v1005_v11 }
 0x2cc   : > { %v1161_v44 = vsel %vm299_vm1, %v2341_v15, -inf  ;;  %1435 = vst.msk [vmem:[%s2309_s10 + $0x18] sm:$0xff] %vm299_vm1, %v2341_v15  ;;  %1441 = vst.msk [vmem:[%s2309_s10 + $0x48] sm:$0xff] %vm299_vm1, %v2343_v16  ;;  %v1172_v48 = vsel %vm299_vm1, %v2343_v16, -inf }
 0x2cd   : > { %v1169_v27 = vmax.f32 %v1161_v44, %v1168_v18  ;;  %v1160_v28 = vsel %vm299_vm1, %v2345_v20, -inf  ;;  %1434 = vst.msk [vmem:[%s2309_s10 + $0x10] sm:$0xff] %vm299_vm1, %v2345_v20  ;;  %1440 = vst.msk [vmem:[%s2309_s10 + $0x40] sm:$0xff] %vm299_vm1, %v2347_v10  ;;  %v1679_v29 = vpop.f32.mrb[20].mxu0  ;;  %v1688_v31 = vpop.f32.mrb[4].mxu1  ;;  %v1170_v51 = vsel %vm299_vm1, %v2347_v10, -inf }
 0x2ce   : > { %v1167_v32 = vmax.f32 %v1160_v28, %v1166_v46  ;;  %v1105_v23 = vadd.f32 %v1679_v29, %v1002_v21  ;;  %v2383_v33 = vadd.f32 %v1688_v31, %v1008_v22  ;;  %v1099_v30 = vpop.f32.mrb[21].mxu0  ;;  %v1129_v34 = vpop.f32.mrb[5].mxu1 }
 0x2cf   : > { %v1100_v35 = vadd.f32 %v1099_v30, %v1001_v25  ;;  %v1130_v37 = vadd.f32 %v1129_v34, %v1007_v26 }
 0x2d0   : > { %v1164_v56 = vsel %vm299_vm1, %v1105_v23, -inf  ;;  %1437 = vst.msk [vmem:[%s2309_s10 + $0x28] sm:$0xff] %vm299_vm1, %v1105_v23  ;;  %v1176_v40 = vsel %vm299_vm1, %v2383_v33, -inf  ;;  %1443 = vst.msk [vmem:[%s2309_s10 + $0x58] sm:$0xff] %vm299_vm1, %v2383_v33 }
 0x2d1   : > { %v1165_v41 = vmax.f32 %v1159_v53, %v1164_v56  ;;  %v1177_v42 = vmax.f32 %v1169_v27, %v1176_v40  ;;  %v1162_v43 = vsel %vm299_vm1, %v1100_v35, -inf  ;;  %1436 = vst.msk [vmem:[%s2309_s10 + $0x20] sm:$0xff] %vm299_vm1, %v1100_v35  ;;  %v1174_v45 = vsel %vm299_vm1, %v1130_v37, -inf  ;;  %1442 = vst.msk [vmem:[%s2309_s10 + $0x50] sm:$0xff] %vm299_vm1, %v1130_v37  ;;  %v1691_v47 = vpop.f32.mrb[6].mxu1 }
 0x2d2   : > { %v1163_v49 = vmax.f32 %v1158_v39, %v1162_v43  ;;  %v1175_v50 = vmax.f32 %v1167_v32, %v1174_v45  ;;  %v1145_v52 = vadd.f32 %v1691_v47, %v1010_v38  ;;  %v1139_v54 = vpop.f32.mrb[7].mxu1 }
 0x2d3   : > { %v1173_v61 = vmax.f32 %v1165_v41, %v1172_v48  ;;  %v1140_v55 = vadd.f32 %v1139_v54, %v1009_v36 }
 0x2d4   : > { %v1180_v58 = vsel %vm299_vm1, %v1145_v52, -inf  ;;  %1445 = vst.msk [vmem:[%s2309_s10 + $0x68] sm:$0xff] %vm299_vm1, %v1145_v52  ;;  %v1171_v1 = vmax.f32 %v1163_v49, %v1170_v51 }
 0x2d5   : > { %v1181_v60 = vmax.f32 %v1173_v61, %v1180_v58  ;;  %v1178_v62 = vsel %vm299_vm1, %v1140_v55, -inf  ;;  %1444 = vst.msk [vmem:[%s2309_s10 + $0x60] sm:$0xff] %vm299_vm1, %v1140_v55  ;;  %v1694_v63 = vpop.f32.mrb[8].mxu1 }
 0x2d6   : > { %v1179_v0 = vmax.f32 %v1171_v1, %v1178_v62  ;;  %v1155_v5 = vadd.f32 %v1694_v63, %v1012_v57  ;;  %v1149_v4 = vpop.f32.mrb[9].mxu1 }
 0x2d7   : > { %v1150_v8 = vadd.f32 %v1149_v4, %v1011_v59 }
 0x2d8   : > { %v1186_v9 = vmax.f32 %v1179_v0, %v1181_v60  ;;  %v1184_v7 = vsel %vm299_vm1, %v1155_v5, -inf  ;;  %1447 = vst.msk [vmem:[%s2309_s10 + $0x78] sm:$0xff] %vm299_vm1, %v1155_v5 }
 0x2d9   : > { %v1185_v11 = vmax.f32 %v1177_v42, %v1184_v7  ;;  %v1182_v12 = vsel %vm299_vm1, %v1150_v8, -inf  ;;  %1446 = vst.msk [vmem:[%s2309_s10 + $0x70] sm:$0xff] %vm299_vm1, %v1150_v8 }
 0x2da   : > { %v1183_v13 = vmax.f32 %v1175_v50, %v1182_v12 }
 0x2dc   : > { %v1187_v14 = vmax.f32 %v1183_v13, %v1185_v11 }
 0x2de   : > { %v1188_v17 = vmax.f32 %v1186_v9, %v1187_v14 }
 0x2e0   : > { %v1189_v19 = vrot.slane %v1188_v17, 4 }
 0x2e2   : > { %v1190_v21 = vmax.f32 %v1188_v17, %v1189_v19 }
 0x2e4   : > { %v1191_v22 = vrot.slane %v1190_v21, 2 }
 0x2e6   : > { %v1192_v18 = vmax.f32 %v1190_v21, %v1191_v22 }
 0x2e8   : > { %v1193_v44 = vrot.slane %v1192_v18, 1 }
 0x2ea   : > { %v1194_v25 = vmax.f32 %v1192_v18, %v1193_v44 }
 0x2ec   : > { %v2432_v26 = vsub.f32 %v2357_v24, %v1194_v25  ;;  %v2435_v46 = vsub.f32 %v2313_v3, %v1194_v25  ;;  %v2438_v27 = vsub.f32 %v2345_v20, %v1194_v25  ;;  %v2441_v28 = vsub.f32 %v2341_v15, %v1194_v25 }
 0x2ed   : > { %v2443_v29 = vsub.f32 %v1100_v35, %v1194_v25  ;;  %v2445_v31 = vsub.f32 %v1105_v23, %v1194_v25  ;;  %v2448_v32 = vsub.f32 %v2315_v6, %v1194_v25  ;;  %v2451_v30 = vsub.f32 %v2311_v2, %v1194_v25 }
 0x2ee   : > { %v2454_v34 = vsub.f32 %v2347_v10, %v1194_v25  ;;  %v2457_v3 = vsub.f32 %v2343_v16, %v1194_v25  ;;  %v2459_v20 = vsub.f32 %v1130_v37, %v1194_v25  ;;  %v2462_v15 = vsub.f32 %v2383_v33, %v1194_v25 }
 0x2ef   : > { %v2464_v35 = vsub.f32 %v1140_v55, %v1194_v25  ;;  %v2466_v23 = vsub.f32 %v1145_v52, %v1194_v25  ;;  %v2468_v6 = vsub.f32 %v1150_v8, %v1194_v25  ;;  %v2470_v38 = vsub.f32 %v1155_v5, %v1194_v25 }
 0x2f0   : > { %v1211_v2 = vmul.f32 1.442695, %v2432_v26  ;;  %v1213_v10 = vmul.f32 1.442695, %v2435_v46  ;;  %v1215_v16 = vmul.f32 1.442695, %v2438_v27 }
 0x2f1   : > { %v1217_v37 = vmul.f32 1.442695, %v2441_v28  ;;  %v1219_v33 = vmul.f32 1.442695, %v2443_v29  ;;  %v1221_v53 = vmul.f32 1.442695, %v2445_v31 }
 0x2f2   : > { %1903 = vpow2.f32 %v1211_v2  ;;  %v1223_v39 = vmul.f32 1.442695, %v2448_v32  ;;  %v1225_v56 = vmul.f32 1.442695, %v2451_v30  ;;  %v1227_v40 = vmul.f32 1.442695, %v2454_v34 }
 0x2f3   : > { %1905 = vpow2.f32 %v1213_v10  ;;  %v1229_v42 = vmul.f32 1.442695, %v2457_v3  ;;  %v1231_v49 = vmul.f32 1.442695, %v2459_v20  ;;  %v1233_v51 = vmul.f32 1.442695, %v2462_v15 }
 0x2f4   : > { %1907 = vpow2.f32 %v1215_v16  ;;  %v1235_v58 = vmul.f32 1.442695, %v2464_v35  ;;  %v1237_v62 = vmul.f32 1.442695, %v2466_v23  ;;  %v1239_v4 = vmul.f32 1.442695, %v2468_v6 }
 0x2f5   : > { %1909 = vpow2.f32 %v1217_v37  ;;  %v1241_v11 = vmul.f32 1.442695, %v2470_v38 }
 0x2f6   : > { %1911 = vpow2.f32 %v1219_v33 }
 0x2f7   : > { %1913 = vpow2.f32 %v1221_v53 }
 0x2f8   : > { %1915 = vpow2.f32 %v1223_v39 }
 0x2f9   : > { %1917 = vpow2.f32 %v1225_v56 }
 0x2fa   : > { %1919 = vpow2.f32 %v1227_v40 }
 0x2fb   : > { %1921 = vpow2.f32 %v1229_v42 }
 0x2fc   : > { %v1904_v36 = vpop.eup %1903  ;;  %1923 = vpow2.f32 %v1231_v49 }
 0x2fd   : > { %v1906_v41 = vpop.eup %1905  ;;  %v1243_v43 = vsel %vm299_vm1, %v1904_v36, 0.0  ;;  %1925 = vpow2.f32 %v1233_v51 }
 0x2fe   : > { %v1908_v45 = vpop.eup %1907  ;;  %v1244_v47 = vsel %vm299_vm1, %v1906_v41, 0.0  ;;  %1927 = vpow2.f32 %v1235_v58 }
 0x2ff   : > { %v1910_v48 = vpop.eup %1909  ;;  %v1245_v50 = vadd.f32 %v1244_v47, %v1243_v43  ;;  %v1246_v52 = vsel %vm299_vm1, %v1908_v45, 0.0  ;;  %1929 = vpow2.f32 %v1237_v62 }
 0x300   : > { %v1912_v54 = vpop.eup %1911  ;;  %v1248_v55 = vsel %vm299_vm1, %v1910_v48, 0.0  ;;  %1931 = vpow2.f32 %v1239_v4  ;;  %v1316_v4 = vld [vmem:[%s2515_s26 + $0x10] sm:$0xff] }
 0x301   : > { %v1247_v61 = vadd.f32 %v1246_v52, %v1245_v50  ;;  %v1914_v57 = vpop.eup %1913  ;;  %v1250_v59 = vsel %vm299_vm1, %v1912_v54, 0.0  ;;  %1933 = vpow2.f32 %v1241_v11  ;;  %v1317_v11 = vld [vmem:[%s2515_s26 + $0x18] sm:$0xff] }
 0x302   : > { %v1916_v60 = vpop.eup %1915  ;;  %v1252_v0 = vsel %vm299_vm1, %v1914_v57, 0.0 }
 0x303   : > { %v1249_v1 = vadd.f32 %v1248_v55, %v1247_v61  ;;  %v1918_v5 = vpop.eup %1917  ;;  %v1254_v9 = vsel %vm299_vm1, %v1916_v60, 0.0 }
 0x304   : > { %v1920_v7 = vpop.eup %1919  ;;  %v1256_v13 = vsel %vm299_vm1, %v1918_v5, 0.0 }
 0x305   : > { %v1251_v63 = vadd.f32 %v1250_v59, %v1249_v1  ;;  %v1922_v14 = vpop.eup %1921  ;;  %v1258_v19 = vsel %vm299_vm1, %v1920_v7, 0.0 }
 0x306   : > { %v1924_v21 = vpop.eup %1923  ;;  %v1260_v18 = vsel %vm299_vm1, %v1922_v14, 0.0 }
 0x307   : > { %v1253_v8 = vadd.f32 %v1252_v0, %v1251_v63  ;;  %v1926_v44 = vpop.eup %1925  ;;  %v1262_v2 = vsel %vm299_vm1, %v1924_v21, 0.0  ;;  %v1315_v63 = vld [vmem:[%s2515_s26 + $0x8] sm:$0xff] }
 0x308   : > { %v1928_v10 = vpop.eup %1927  ;;  %v1264_v37 = vsel %vm299_vm1, %v1926_v44, 0.0 }
 0x309   : > { %v1255_v12 = vadd.f32 %v1254_v9, %v1253_v8  ;;  %v1930_v33 = vpop.eup %1929  ;;  %v1266_v39 = vsel %vm299_vm1, %v1928_v10, 0.0  ;;  %v1320_v10 = vld [vmem:[%s2515_s26 + $0x30] sm:$0xff] }
 0x30a   : > { %v1932_v56 = vpop.eup %1931  ;;  %v1268_v36 = vsel %vm299_vm1, %v1930_v33, 0.0 }
 0x30b   : > { %v1257_v17 = vadd.f32 %v1256_v13, %v1255_v12  ;;  %v1934_v41 = vpop.eup %1933  ;;  %v1270_v43 = vsel %vm299_vm1, %v1932_v56, 0.0 }
 0x30c   : > { %v1272_v47 = vsel %vm299_vm1, %v1934_v41, 0.0 }
 0x30d   : > { %v1259_v22 = vadd.f32 %v1258_v19, %v1257_v17 }
 0x30f   : > { %v1261_v25 = vadd.f32 %v1260_v18, %v1259_v22  ;;  %v1319_v22 = vld [vmem:[%s2515_s26 + $0x28] sm:$0xff] }
 0x311   : > { %v1263_v16 = vadd.f32 %v1262_v2, %v1261_v25 }
 0x313   : > { %v1265_v53 = vadd.f32 %v1264_v37, %v1263_v16 }
 0x315   : > { %v1267_v40 = vadd.f32 %v1266_v39, %v1265_v53  ;;  %v1321_v39 = vld [vmem:[%s2515_s26 + $0x38] sm:$0xff] }
 0x317   : > { %v1269_v42 = vadd.f32 %v1268_v36, %v1267_v40 }
 0x319   : > { %v1271_v45 = vadd.f32 %v1270_v43, %v1269_v42  ;;  %v1322_v42 = vld [vmem:[%s2515_s26 + $0x40] sm:$0xff] }
 0x31b   : > { %v1273_v48 = vadd.f32 %v1272_v47, %v1271_v45 }
 0x31d   : > { %v1274_v49 = vrot.slane %v1273_v48, 4 }
 0x31f   : > { %v1275_v50 = vadd.f32 %v1274_v49, %v1273_v48  ;;  %v1323_v49 = vld [vmem:[%s2515_s26 + $0x48] sm:$0xff] }
 0x321   : > { %v1276_v52 = vrot.slane %v1275_v50, 2 }
 0x323   : > { %v1277_v54 = vadd.f32 %v1276_v52, %v1275_v50 }
 0x325   : > { %v1278_v51 = vrot.slane %v1277_v54, 1 }
 0x327   : > { %v1279_v61 = vadd.f32 %v1278_v51, %v1277_v54 }
 0x329   : > { %1935 = vlog2.f32 %v1279_v61  ;;  %v1324_v61 = vld [vmem:[%s2515_s26 + $0x50] sm:$0xff] }
 0x333   : > { %v1936_v55 = vpop.eup %1935 }
 0x334   : > { %v2504_v57 = vmul.f32 0.6931472, %v1936_v55 }
 0x336   : > { %v1282_v58 = vsub.f32 %v2432_v26, %v2504_v57  ;;  %v1283_v1 = vsub.f32 %v2435_v46, %v2504_v57  ;;  %v1284_v59 = vsub.f32 %v2438_v27, %v2504_v57  ;;  %v1285_v60 = vsub.f32 %v2441_v28, %v2504_v57  ;;  %v1314_v46 = vld [vmem:[%s2515_s26] sm:$0xff] }
 0x337   : > { %v1286_v0 = vsub.f32 %v2443_v29, %v2504_v57  ;;  %v1287_v8 = vsub.f32 %v2445_v31, %v2504_v57  ;;  %v1288_v28 = vsub.f32 %v2448_v32, %v2504_v57  ;;  %v1289_v14 = vsub.f32 %v2451_v30, %v2504_v57  ;;  %v1318_v29 = vld [vmem:[%s2515_s26 + $0x20] sm:$0xff] }
 0x338   : > { %v1298_v26 = vsub.f32 0.0, %v1282_v58  ;;  %v1299_v62 = vsub.f32 0.0, %v1283_v1  ;;  %v1300_v5 = vsub.f32 0.0, %v1284_v59  ;;  %v1301_v9 = vsub.f32 0.0, %v1285_v60  ;;  %v1325_v60 = vld [vmem:[%s2515_s26 + $0x58] sm:$0xff] }
 0x339   : > { %v1302_v12 = vsub.f32 0.0, %v1286_v0  ;;  %v1303_v17 = vsub.f32 0.0, %v1287_v8  ;;  %v1290_v44 = vsub.f32 %v2454_v34, %v2504_v57  ;;  %v1304_v32 = vsub.f32 0.0, %v1288_v28  ;;  %v1326_v0 = vld [vmem:[%s2515_s26 + $0x60] sm:$0xff] }
 0x33a   : > { %v1330_v7 = vmul.f32 %v1314_v46, %v1298_v26  ;;  %v1331_v27 = vmul.f32 %v1315_v63, %v1299_v62  ;;  %v1332_v13 = vmul.f32 %v1316_v4, %v1300_v5  ;;  %v1333_v19 = vmul.f32 %v1317_v11, %v1301_v9 }
 0x33b   : > { %v1334_v25 = vmul.f32 %v1318_v29, %v1302_v12  ;;  %v1291_v16 = vsub.f32 %v2457_v3, %v2504_v57  ;;  %v1305_v37 = vsub.f32 0.0, %v1289_v14  ;;  %v1335_v33 = vmul.f32 %v1319_v22, %v1303_v17  ;;  %v1328_v12 = vld [vmem:[%s2515_s26 + $0x70] sm:$0xff] }
 0x33c   : > { %v1346_v21 = vsel %vm299_vm1, %v1330_v7, 0.0  ;;  %v1347_v31 = vsel %vm299_vm1, %v1331_v27, 0.0  ;;  %v1349_v2 = vsel %vm299_vm1, %v1332_v13, 0.0  ;;  %v1351_v53 = vsel %vm299_vm1, %v1333_v19, 0.0  ;;  %v1327_v7 = vld [vmem:[%s2515_s26 + $0x68] sm:$0xff]  ;;  %v1329_v19 = vld [vmem:[%s2515_s26 + $0x78] sm:$0xff] }
 0x33d   : > { %v1348_v18 = vadd.f32 %v1347_v31, %v1346_v21  ;;  %v1292_v34 = vsub.f32 %v2459_v20, %v2504_v57  ;;  %v1306_v40 = vsub.f32 0.0, %v1290_v44  ;;  %v1336_v36 = vmul.f32 %v1320_v10, %v1304_v32 }
 0x33e   : > { %v1353_v41 = vsel %vm299_vm1, %v1334_v25, 0.0  ;;  %v1293_v3 = vsub.f32 %v2462_v15, %v2504_v57  ;;  %v1307_v45 = vsub.f32 0.0, %v1291_v16  ;;  %v1337_v47 = vmul.f32 %v1321_v39, %v1305_v37 }
 0x33f   : > { %v1350_v30 = vadd.f32 %v1349_v2, %v1348_v18  ;;  %v1355_v48 = vsel %vm299_vm1, %v1335_v33, 0.0  ;;  %v1294_v20 = vsub.f32 %v2464_v35, %v2504_v57  ;;  %v1308_v52 = vsub.f32 0.0, %v1292_v34 }
 0x340   : > { %v1338_v54 = vmul.f32 %v1322_v42, %v1306_v40  ;;  %v1357_v51 = vsel %vm299_vm1, %v1336_v36, 0.0  ;;  %v1295_v15 = vsub.f32 %v2466_v23, %v2504_v57  ;;  %v1309_v58 = vsub.f32 0.0, %v1293_v3 }
 0x341   : > { %v1352_v56 = vadd.f32 %v1351_v53, %v1350_v30  ;;  %v1339_v1 = vmul.f32 %v1323_v49, %v1307_v45  ;;  %v1359_v59 = vsel %vm299_vm1, %v1337_v47, 0.0  ;;  %v1296_v35 = vsub.f32 %v2468_v6, %v2504_v57 }
 0x342   : > { %v1310_v62 = vsub.f32 0.0, %v1294_v20  ;;  %v1340_v46 = vmul.f32 %v1324_v61, %v1308_v52  ;;  %v1361_v63 = vsel %vm299_vm1, %v1338_v54, 0.0  ;;  %v1297_v23 = vsub.f32 %v2470_v38, %v2504_v57 }
 0x343   : > { %v1354_v43 = vadd.f32 %v1353_v41, %v1352_v56  ;;  %v1311_v4 = vsub.f32 0.0, %v1295_v15  ;;  %v1341_v8 = vmul.f32 %v1325_v60, %v1309_v58  ;;  %v1363_v9 = vsel %vm299_vm1, %v1339_v1, 0.0 }
 0x344   : > { %v1312_v11 = vsub.f32 0.0, %v1296_v35  ;;  %v1342_v28 = vmul.f32 %v1326_v0, %v1310_v62  ;;  %v1365_v6 = vsel %vm299_vm1, %v1340_v46, 0.0  ;;  %v1313_v14 = vsub.f32 0.0, %v1297_v23 }
 0x345   : > { %v1356_v50 = vadd.f32 %v1355_v48, %v1354_v43  ;;  %v1343_v29 = vmul.f32 %v1327_v7, %v1311_v4  ;;  %v1367_v17 = vsel %vm299_vm1, %v1341_v8, 0.0  ;;  %v1383_v16 = vlaneseq }
 0x346   : > { %v1344_v31 = vmul.f32 %v1328_v12, %v1312_v11  ;;  %v1369_v38 = vsel %vm299_vm1, %v1342_v28, 0.0  ;;  %v1345_v22 = vmul.f32 %v1329_v19, %v1313_v14 }
 0x347   : > { %v1358_v55 = vadd.f32 %v1357_v51, %v1356_v50  ;;  %v1371_v18 = vsel %vm299_vm1, %v1343_v29, 0.0  ;;  %v1384_v53 = vshrl.u32 %v1383_v16, 7 }
 0x348   : > { %v1373_v32 = vsel %vm299_vm1, %v1344_v31, 0.0  ;;  %v1375_v2 = vsel %vm299_vm1, %v1345_v22, 0.0 }
 0x349   : > { %v1360_v26 = vadd.f32 %v1359_v59, %v1358_v55  ;;  %vm1400_vm3 = vcmp.eq.s32.totalorder %v1384_v53, 4 }
 0x34b   : > { %v1362_v5 = vadd.f32 %v1361_v63, %v1360_v26 }
 0x34d   : > { %v1364_v27 = vadd.f32 %v1363_v9, %v1362_v5 }
 0x34f   : > { %v1366_v13 = vadd.f32 %v1365_v6, %v1364_v27 }
 0x351   : > { %v1368_v21 = vadd.f32 %v1367_v17, %v1366_v13 }
 0x353   : > { %v1370_v57 = vadd.f32 %v1369_v38, %v1368_v21 }
 0x355   : > { %v1372_v44 = vadd.f32 %v1371_v18, %v1370_v57 }
 0x357   : > { %v1374_v25 = vadd.f32 %v1373_v32, %v1372_v44 }
 0x359   : > { %v1376_v10 = vadd.f32 %v1375_v2, %v1374_v25 }
 0x35b   : > { %v1377_v30 = vrot.slane %v1376_v10, 4 }
 0x35d   : > { %v1378_v37 = vadd.f32 %v1377_v30, %v1376_v10 }
 0x35f   : > { %v1379_v33 = vrot.slane %v1378_v37, 2 }
 0x361   : > { %v1380_v39 = vadd.f32 %v1379_v33, %v1378_v37 }
 0x363   : > { %v1381_v56 = vrot.slane %v1380_v39, 1 }
 0x365   : > { %v1382_v34 = vadd.f32 %v1381_v56, %v1380_v39 }
 0x367   : > { %v1416_v40 = vsel %vm1400_vm3, %v1382_v34, %v2357_v24 }
 0x368   : > { %1432 = vst.msk [vmem:[%s2309_s10] sm:$0xff] %vm299_vm1, %v1416_v40 }
 0x369 PF: > { %s16_s23 = sadd.s32 1, %s1959_s23   ;;  %s2596_s21 = smov %s1955_s22 }
 0x36a   : > { %p13_p5 = scmp.ge.s32.totalorder %s16_s23, 4   ;;  %s2597_s22 = smov %s2599_s24 }
 0x36c   :  { %15 = sbr.rel (!%p13_p5) target bundleno = 2 (0x2), region = 85 }

</bundles_post_ra>
